<compile_context>
chip_gen: v7x
topology: tpu7x:2x2x1
jax: 0.10.0
libtpu: 0.0.40
codegen_flags: <defaults>
</compile_context>

<pallas_src>
import math
import functools

import jax
import jax.numpy as jnp
from jax.experimental import pallas as pl
from jax.experimental.pallas import tpu as pltpu


def _decoder_kernel(q1_ref, kT1_ref, v1_ref, kT2_ref, v2_ref,
                    src_bias_ref, trg_bias_ref,
                    wq_ref, bq_ref, wo_ref, bo_ref,
                    w1_ref, b1_ref, w2_ref, b2_ref,
                    out_ref, *, n_heads, d_head):
    # Block shapes:
    #   q1_ref      (1, H, TQ, dh) bf16   pre-scaled self-attn Q heads (this q tile)
    #   kT1/kT2_ref (1, H, dh, S)  bf16   K^T, head-major (self / cross)
    #   v1/v2_ref   (1, H, S, dh)  bf16   V, head-major (self / cross)
    #   src_bias    (1, 1, S)      bf16   additive mask bias (0 / -1e9)
    #   trg_bias    (1, TQ, S)     bf16   additive mask bias (0 / -1e9)
    #   wq (D,D) bq (1,D) wo (H,dh,D) bo (1,D) w1 (D,F) b1 (1,F) w2 (F,D) b2 (1,D)
    scale = 1.0 / math.sqrt(d_head)

    def attention(q_head_fn, kT_ref, v_ref, bias_f):
        """Shared-weight MHA body for one query tile; returns (TQ, D) f32."""
        out = None
        for h in range(n_heads):                              # short static loop
            qh = q_head_fn(h)                                 # (TQ, dh) bf16
            # scores: (TQ, dh) @ (dh, S) -> (TQ, S), f32 accumulation on the MXU
            s = jnp.dot(qh, kT_ref[0, h], preferred_element_type=jnp.float32)
            s = s + bias_f                                    # additive mask
            m = jnp.max(s, axis=-1, keepdims=True)
            p = jnp.exp(s - m)                                # unnormalized, in (0, 1]
            denom = jnp.sum(p, axis=-1, keepdims=True)
            # p@V first, then normalize the small (TQ, dh) result (EUP reciprocal).
            ctx = jnp.dot(p.astype(jnp.bfloat16), v_ref[0, h],
                          preferred_element_type=jnp.float32)  # (TQ, dh)
            ctx = ctx * pl.reciprocal(denom, approx=True)
            # Per-head accumulation into the output projection (no concat).
            oh = jnp.dot(ctx.astype(jnp.bfloat16), wo_ref[h],
                         preferred_element_type=jnp.float32)   # (TQ, D)
            out = oh if out is None else out + oh
        return out + bo_ref[...]
    # Note: a fully-masked query row yields a uniform softmax (same as the -1e9
    # reference), not NaN.

    trg_bias = trg_bias_ref[0].astype(jnp.float32)            # (TQ, S)
    src_bias = src_bias_ref[0].astype(jnp.float32)            # (1, S) -> broadcasts

    # 1) Masked self-attention: Q/K/V precomputed outside (head-major, Q pre-scaled).
    out1 = attention(lambda h: q1_ref[0, h], kT1_ref, v1_ref, trg_bias)

    # 2) Encoder-decoder attention (same weights): query projection in-kernel,
    #    full-width (TQ,D)@(D,D) on the MXU, scale folded in once.
    out1_bf = out1.astype(jnp.bfloat16)
    q2 = (jnp.dot(out1_bf, wq_ref[...], preferred_element_type=jnp.float32)
          + bq_ref[...]) * scale
    q2_bf = q2.astype(jnp.bfloat16)
    out2 = attention(lambda h: q2_bf[:, h * d_head:(h + 1) * d_head],
                     kT2_ref, v2_ref, src_bias)

    # 3) Position-wise feed-forward.
    #    (For very large d_ff on v7x, tile this over F with accumulation.)
    h1 = jnp.maximum(
        jnp.dot(out2.astype(jnp.bfloat16), w1_ref[...],
                preferred_element_type=jnp.float32) + b1_ref[...], 0.0)
    ff = jnp.dot(h1.astype(jnp.bfloat16), w2_ref[...],
                 preferred_element_type=jnp.float32) + b2_ref[...]

    out_ref[0] = ff.astype(out_ref.dtype)


def decoder_pallas(inp, enc_out, src_mask, trg_mask, params, n_heads, *, q_tile=256):
    """q_tile=256 fills the 256-wide MXU on v6e/v7x; use 128 on v5e or when
    v7x's 64 MiB VMEM is tight.  Requires S % TQ == 0 and the usual (8,128)
    BlockSpec rule on the last two block dims (or full-dim blocks)."""
    B, S, D = inp.shape
    assert D % n_heads == 0
    dh = D // n_heads
    F = params["W1"].shape[1]

    TQ = S if S <= q_tile else q_tile
    assert S % TQ == 0, "maxlen must be divisible by the query tile"
    n_q = S // TQ

    scale = 1.0 / math.sqrt(dh)

    # ---- Hoisted once-per-batch projections (plain XLA), head-major, bf16 ----
    def proj_heads(x, W, b):                       # (B,S,D) -> (B,H,S,dh), f32
        y = jnp.einsum("bsd,df->bsf", x, W) + b
        return y.reshape(B, S, n_heads, dh).transpose(0, 2, 1, 3)

    q_self = (proj_heads(inp, params["Wq"], params["bq"]) * scale).astype(jnp.bfloat16)
    k_self_T = proj_heads(inp, params["Wk"], params["bk"]
                          ).transpose(0, 1, 3, 2).astype(jnp.bfloat16)       # (B,H,dh,S)
    v_self = proj_heads(inp, params["Wv"], params["bv"]).astype(jnp.bfloat16)  # (B,H,S,dh)
    k_cross_T = proj_heads(enc_out, params["Wk"], params["bk"]
                           ).transpose(0, 1, 3, 2).astype(jnp.bfloat16)
    v_cross = proj_heads(enc_out, params["Wv"], params["bv"]).astype(jnp.bfloat16)

    # Additive attention bias (0 attended / -1e9 masked), bf16 to halve traffic.
    neg = jnp.float32(-1e9)
    trg_bias = jnp.where(trg_mask == 0, neg, 0.0).astype(jnp.bfloat16)   # (B, S, S)
    src_bias = jnp.where(src_mask == 0, neg, 0.0).astype(jnp.bfloat16)   # (B, 1, S)

    # Weights: bf16, head-major Wo (H, dh, D); biases as f32 rows.
    wo_heads = params["Wo"].reshape(n_heads, dh, D).astype(jnp.bfloat16)
    bf = lambda a: a.astype(jnp.bfloat16)
    row = lambda v: v.reshape(1, -1).astype(jnp.float32)

    # Constant index_map -> fetched once, resident across the grid.
    # (On v7x, VMEM can additionally be saved by single-buffering these constant
    #  specs with pipeline_mode=pl.Buffered(1); not needed at these sizes.)
    full = lambda shape: pl.BlockSpec(shape, lambda b, q: (0,) * len(shape))

    kernel = functools.partial(_decoder_kernel, n_heads=n_heads, d_head=dh)

    return pl.pallas_call(
        kernel,
        out_shape=jax.ShapeDtypeStruct((B, S, D), jnp.float32),
        grid_spec=pltpu.PrefetchScalarGridSpec(
            num_scalar_prefetch=0,
            grid=(B, n_q),
            in_specs=[
                pl.BlockSpec((1, n_heads, TQ, dh), lambda b, q: (b, 0, q, 0)),  # Q_self heads
                pl.BlockSpec((1, n_heads, dh, S), lambda b, q: (b, 0, 0, 0)),   # K_self^T
                pl.BlockSpec((1, n_heads, S, dh), lambda b, q: (b, 0, 0, 0)),   # V_self
                pl.BlockSpec((1, n_heads, dh, S), lambda b, q: (b, 0, 0, 0)),   # K_cross^T
                pl.BlockSpec((1, n_heads, S, dh), lambda b, q: (b, 0, 0, 0)),   # V_cross
                pl.BlockSpec((1, 1, S), lambda b, q: (b, 0, 0)),                # src bias
                pl.BlockSpec((1, TQ, S), lambda b, q: (b, q, 0)),               # trg bias
                full((D, D)), full((1, D)),                                     # Wq, bq
                full((n_heads, dh, D)), full((1, D)),                           # Wo(head-major), bo
                full((D, F)), full((1, F)),                                     # W1, b1
                full((F, D)), full((1, D)),                                     # W2, b2
            ],
            out_specs=pl.BlockSpec((1, TQ, D), lambda b, q: (b, q, 0)),
        ),
        compiler_params=pltpu.CompilerParams(
            dimension_semantics=("parallel", "parallel"),   # B first -> v7x 2-TC split
            vmem_limit_bytes=64 * 1024 * 1024),
    )(q_self, k_self_T, v_self, k_cross_T, v_cross, src_bias, trg_bias,
      bf(params["Wq"]), row(params["bq"]),
      wo_heads, row(params["bo"]),
      bf(params["W1"]), row(params["b1"]),
      bf(params["W2"]), row(params["b2"]))


# ----------------------- pure-JAX f32 reference (for checking) -----------------------
def _mha_ref(q_in, kv_in, mask, p, n_heads):
    B, S, D = q_in.shape
    dh = D // n_heads
    q = q_in @ p["Wq"] + p["bq"]
    k = kv_in @ p["Wk"] + p["bk"]
    v = kv_in @ p["Wv"] + p["bv"]
    qh = q.reshape(B, S, n_heads, dh).transpose(0, 2, 1, 3)
    kh = k.reshape(B, S, n_heads, dh).transpose(0, 2, 1, 3)
    vh = v.reshape(B, S, n_heads, dh).transpose(0, 2, 1, 3)
    s = jnp.einsum("bhqd,bhkd->bhqk", qh, kh) / math.sqrt(dh)
    s = jnp.where(mask[:, None, :, :] == 0, -1e9, s)
    a = jax.nn.softmax(s, axis=-1)
    o = jnp.einsum("bhqk,bhkd->bhqd", a, vh)
    o = o.transpose(0, 2, 1, 3).reshape(B, S, D)
    return o @ p["Wo"] + p["bo"]


def decoder_ref(inp, enc_out, src_mask, trg_mask, p, n_heads):
    out = _mha_ref(inp, inp, trg_mask, p, n_heads)
    out = _mha_ref(out, enc_out, src_mask, p, n_heads)
    h = jax.nn.relu(out @ p["W1"] + p["b1"])
    return h @ p["W2"] + p["b2"]


if __name__ == "__main__":
    # Small, module-consistent shapes.
    B, S, D, F, H = 2, 8, 32, 64, 4   # batch, maxlen, d_m, d_ff, n_heads

    key = jax.random.PRNGKey(0)
    keys = jax.random.split(key, 16)

    def init(k, shape):
        return (0.05 * jax.random.normal(k, shape)).astype(jnp.float32)

    params = {
        "Wq": init(keys[0], (D, D)), "bq": init(keys[1], (D,)),
        "Wk": init(keys[2], (D, D)), "bk": init(keys[3], (D,)),
        "Wv": init(keys[4], (D, D)), "bv": init(keys[5], (D,)),
        "Wo": init(keys[6], (D, D)), "bo": init(keys[7], (D,)),
        "W1": init(keys[8], (D, F)), "b1": init(keys[9], (F,)),
        "W2": init(keys[10], (F, D)), "b2": init(keys[11], (D,)),
    }

    inp = jax.random.normal(keys[12], (B, S, D), dtype=jnp.float32)
    enc_out = jax.random.normal(keys[13], (B, S, D), dtype=jnp.float32)
    # trg_mask: causal lower-triangular [B, S, S]; src_mask: pad mask [B, 1, S]
    trg_mask = jnp.broadcast_to(jnp.tril(jnp.ones((S, S), jnp.float32)), (B, S, S))
    src_mask = (jnp.arange(S)[None, None, :] < 6).astype(jnp.float32)
    src_mask = jnp.broadcast_to(src_mask, (B, 1, S))

    out = decoder_pallas(inp, enc_out, src_mask, trg_mask, params, H)
    out = jax.block_until_ready(out)

    ref = decoder_ref(inp, enc_out, src_mask, trg_mask, params, H)
    assert out.shape == (B, S, D)
    # bf16 MXU inputs (f32 accumulation) + approx reciprocal -> looser tolerance
    # than a pure-f32 bitwise match, still tight enough to catch real bugs.
    assert jnp.allclose(out, ref, rtol=2e-2, atol=2e-2), "mismatch vs reference"

    print("KERNEL_OK")
</pallas_src>

<mosaic_0001>
module attributes {stable_mosaic.version = 11 : i64} {
  func.func @_decoder_kernel(%arg0: i32, %arg1: i32, %arg2: memref<1x4x8x8xbf16, #tpu.memory_space<vmem>>, %arg3: memref<1x4x8x8xbf16, #tpu.memory_space<vmem>>, %arg4: memref<1x4x8x8xbf16, #tpu.memory_space<vmem>>, %arg5: memref<1x4x8x8xbf16, #tpu.memory_space<vmem>>, %arg6: memref<1x4x8x8xbf16, #tpu.memory_space<vmem>>, %arg7: memref<1x1x8xbf16, #tpu.memory_space<vmem>>, %arg8: memref<1x8x8xbf16, #tpu.memory_space<vmem>>, %arg9: memref<32x32xbf16, #tpu.memory_space<vmem>>, %arg10: memref<1x32xf32, #tpu.memory_space<vmem>>, %arg11: memref<4x8x32xbf16, #tpu.memory_space<vmem>>, %arg12: memref<1x32xf32, #tpu.memory_space<vmem>>, %arg13: memref<32x64xbf16, #tpu.memory_space<vmem>>, %arg14: memref<1x64xf32, #tpu.memory_space<vmem>>, %arg15: memref<64x32xbf16, #tpu.memory_space<vmem>>, %arg16: memref<1x32xf32, #tpu.memory_space<vmem>>, %arg17: memref<1x8x32xf32, #tpu.memory_space<vmem>>) attributes {dimension_semantics = [#tpu.dimension_semantics<parallel>, #tpu.dimension_semantics<parallel>], iteration_bounds = array<i64: 2, 1>, scalar_prefetch = 0 : i64, scratch_operands = 0 : i64, tpu.core_type = #tpu.core_type<tc>, window_params = [{transform_indices = @transform_0, window_bounds = array<i64: 1, 4, 8, 8>}, {transform_indices = @transform_1, window_bounds = array<i64: 1, 4, 8, 8>}, {transform_indices = @transform_2, window_bounds = array<i64: 1, 4, 8, 8>}, {transform_indices = @transform_3, window_bounds = array<i64: 1, 4, 8, 8>}, {transform_indices = @transform_4, window_bounds = array<i64: 1, 4, 8, 8>}, {transform_indices = @transform_5, window_bounds = array<i64: 1, 1, 8>}, {transform_indices = @transform_6, window_bounds = array<i64: 1, 8, 8>}, {pipeline_mode = #tpu.pipeline_mode<synchronous>, transform_indices = @transform_7, window_bounds = array<i64: 32, 32>}, {pipeline_mode = #tpu.pipeline_mode<synchronous>, transform_indices = @transform_8, window_bounds = array<i64: 1, 32>}, {pipeline_mode = #tpu.pipeline_mode<synchronous>, transform_indices = @transform_9, window_bounds = array<i64: 4, 8, 32>}, {pipeline_mode = #tpu.pipeline_mode<synchronous>, transform_indices = @transform_10, window_bounds = array<i64: 1, 32>}, {pipeline_mode = #tpu.pipeline_mode<synchronous>, transform_indices = @transform_11, window_bounds = array<i64: 32, 64>}, {pipeline_mode = #tpu.pipeline_mode<synchronous>, transform_indices = @transform_12, window_bounds = array<i64: 1, 64>}, {pipeline_mode = #tpu.pipeline_mode<synchronous>, transform_indices = @transform_13, window_bounds = array<i64: 64, 32>}, {pipeline_mode = #tpu.pipeline_mode<synchronous>, transform_indices = @transform_14, window_bounds = array<i64: 1, 32>}, {transform_indices = @transform_15, window_bounds = array<i64: 1, 8, 32>}]} {
    %c0 = arith.constant 0 : index
    %c0_0 = arith.constant 0 : index
    %c0_1 = arith.constant 0 : index
    %0 = vector.load %arg8[%c0, %c0_0, %c0_1] : memref<1x8x8xbf16, #tpu.memory_space<vmem>>, vector<1x8x8xbf16>
    %1 = vector.shape_cast %0 : vector<1x8x8xbf16> to vector<8x8xbf16>
    %2 = arith.extf %1 : vector<8x8xbf16> to vector<8x8xf32>
    %c0_2 = arith.constant 0 : index
    %c0_3 = arith.constant 0 : index
    %c0_4 = arith.constant 0 : index
    %3 = vector.load %arg7[%c0_2, %c0_3, %c0_4] : memref<1x1x8xbf16, #tpu.memory_space<vmem>>, vector<1x1x8xbf16>
    %4 = vector.shape_cast %3 : vector<1x1x8xbf16> to vector<1x8xbf16>
    %5 = arith.extf %4 : vector<1x8xbf16> to vector<1x8xf32>
    %c0_5 = arith.constant 0 : index
    %c0_6 = arith.constant 0 : index
    %c0_7 = arith.constant 0 : index
    %c0_8 = arith.constant 0 : index
    %6 = vector.load %arg2[%c0_5, %c0_6, %c0_7, %c0_8] : memref<1x4x8x8xbf16, #tpu.memory_space<vmem>>, vector<1x1x8x8xbf16>
    %7 = vector.shape_cast %6 : vector<1x1x8x8xbf16> to vector<8x8xbf16>
    %c0_9 = arith.constant 0 : index
    %c0_10 = arith.constant 0 : index
    %c0_11 = arith.constant 0 : index
    %c0_12 = arith.constant 0 : index
    %8 = vector.load %arg3[%c0_9, %c0_10, %c0_11, %c0_12] : memref<1x4x8x8xbf16, #tpu.memory_space<vmem>>, vector<1x1x8x8xbf16>
    %9 = vector.shape_cast %8 : vector<1x1x8x8xbf16> to vector<8x8xbf16>
    %cst = arith.constant dense<0.000000e+00> : vector<8x8xf32>
    %10 = tpu.matmul %7, %9, %cst {dimension_numbers = #tpu.dot_dimension_numbers<[1], [0], [0], [1], [0, 0, 1, 1], [], []>} : vector<8x8xbf16>, vector<8x8xbf16>, vector<8x8xf32> -> vector<8x8xf32>
    %11 = arith.addf %10, %2 : vector<8x8xf32>
    %cst_13 = arith.constant dense<0xFF800000> : vector<8xf32>
    %12 = vector.multi_reduction <maximumf>, %11, %cst_13 [1] : vector<8x8xf32> to vector<8xf32>
    %13 = vector.shape_cast %12 : vector<8xf32> to vector<8x1xf32>
    %14 = vector.broadcast %13 : vector<8x1xf32> to vector<8x8xf32>
    %15 = arith.subf %11, %14 : vector<8x8xf32>
    %16 = math.exp %15 : vector<8x8xf32>
    %cst_14 = arith.constant dense<0.000000e+00> : vector<8xf32>
    %17 = vector.multi_reduction <add>, %16, %cst_14 [1] : vector<8x8xf32> to vector<8xf32>
    %18 = vector.shape_cast %17 : vector<8xf32> to vector<8x1xf32>
    %19 = arith.truncf %16 : vector<8x8xf32> to vector<8x8xbf16>
    %c0_15 = arith.constant 0 : index
    %c0_16 = arith.constant 0 : index
    %c0_17 = arith.constant 0 : index
    %c0_18 = arith.constant 0 : index
    %20 = vector.load %arg4[%c0_15, %c0_16, %c0_17, %c0_18] : memref<1x4x8x8xbf16, #tpu.memory_space<vmem>>, vector<1x1x8x8xbf16>
    %21 = vector.shape_cast %20 : vector<1x1x8x8xbf16> to vector<8x8xbf16>
    %cst_19 = arith.constant dense<0.000000e+00> : vector<8x8xf32>
    %22 = tpu.matmul %19, %21, %cst_19 {dimension_numbers = #tpu.dot_dimension_numbers<[1], [0], [0], [1], [0, 0, 1, 1], [], []>} : vector<8x8xbf16>, vector<8x8xbf16>, vector<8x8xf32> -> vector<8x8xf32>
    %23 = tpu.reciprocal %18 {approx = true} : vector<8x1xf32> -> vector<8x1xf32>
    %24 = vector.broadcast %23 : vector<8x1xf32> to vector<8x8xf32>
    %25 = arith.mulf %22, %24 : vector<8x8xf32>
    %26 = arith.truncf %25 : vector<8x8xf32> to vector<8x8xbf16>
    %c0_20 = arith.constant 0 : index
    %c0_21 = arith.constant 0 : index
    %c0_22 = arith.constant 0 : index
    %27 = vector.load %arg11[%c0_20, %c0_21, %c0_22] : memref<4x8x32xbf16, #tpu.memory_space<vmem>>, vector<1x8x32xbf16>
    %28 = vector.shape_cast %27 : vector<1x8x32xbf16> to vector<8x32xbf16>
    %cst_23 = arith.constant dense<0.000000e+00> : vector<8x32xf32>
    %29 = tpu.matmul %26, %28, %cst_23 {dimension_numbers = #tpu.dot_dimension_numbers<[1], [0], [0], [1], [0, 0, 1, 1], [], []>} : vector<8x8xbf16>, vector<8x32xbf16>, vector<8x32xf32> -> vector<8x32xf32>
    %c0_24 = arith.constant 0 : index
    %c1 = arith.constant 1 : index
    %c0_25 = arith.constant 0 : index
    %c0_26 = arith.constant 0 : index
    %30 = vector.load %arg2[%c0_24, %c1, %c0_25, %c0_26] : memref<1x4x8x8xbf16, #tpu.memory_space<vmem>>, vector<1x1x8x8xbf16>
    %31 = vector.shape_cast %30 : vector<1x1x8x8xbf16> to vector<8x8xbf16>
    %c0_27 = arith.constant 0 : index
    %c1_28 = arith.constant 1 : index
    %c0_29 = arith.constant 0 : index
    %c0_30 = arith.constant 0 : index
    %32 = vector.load %arg3[%c0_27, %c1_28, %c0_29, %c0_30] : memref<1x4x8x8xbf16, #tpu.memory_space<vmem>>, vector<1x1x8x8xbf16>
    %33 = vector.shape_cast %32 : vector<1x1x8x8xbf16> to vector<8x8xbf16>
    %cst_31 = arith.constant dense<0.000000e+00> : vector<8x8xf32>
    %34 = tpu.matmul %31, %33, %cst_31 {dimension_numbers = #tpu.dot_dimension_numbers<[1], [0], [0], [1], [0, 0, 1, 1], [], []>} : vector<8x8xbf16>, vector<8x8xbf16>, vector<8x8xf32> -> vector<8x8xf32>
    %35 = arith.addf %34, %2 : vector<8x8xf32>
    %cst_32 = arith.constant dense<0xFF800000> : vector<8xf32>
    %36 = vector.multi_reduction <maximumf>, %35, %cst_32 [1] : vector<8x8xf32> to vector<8xf32>
    %37 = vector.shape_cast %36 : vector<8xf32> to vector<8x1xf32>
    %38 = vector.broadcast %37 : vector<8x1xf32> to vector<8x8xf32>
    %39 = arith.subf %35, %38 : vector<8x8xf32>
    %40 = math.exp %39 : vector<8x8xf32>
    %cst_33 = arith.constant dense<0.000000e+00> : vector<8xf32>
    %41 = vector.multi_reduction <add>, %40, %cst_33 [1] : vector<8x8xf32> to vector<8xf32>
    %42 = vector.shape_cast %41 : vector<8xf32> to vector<8x1xf32>
    %43 = arith.truncf %40 : vector<8x8xf32> to vector<8x8xbf16>
    %c0_34 = arith.constant 0 : index
    %c1_35 = arith.constant 1 : index
    %c0_36 = arith.constant 0 : index
    %c0_37 = arith.constant 0 : index
    %44 = vector.load %arg4[%c0_34, %c1_35, %c0_36, %c0_37] : memref<1x4x8x8xbf16, #tpu.memory_space<vmem>>, vector<1x1x8x8xbf16>
    %45 = vector.shape_cast %44 : vector<1x1x8x8xbf16> to vector<8x8xbf16>
    %cst_38 = arith.constant dense<0.000000e+00> : vector<8x8xf32>
    %46 = tpu.matmul %43, %45, %cst_38 {dimension_numbers = #tpu.dot_dimension_numbers<[1], [0], [0], [1], [0, 0, 1, 1], [], []>} : vector<8x8xbf16>, vector<8x8xbf16>, vector<8x8xf32> -> vector<8x8xf32>
    %47 = tpu.reciprocal %42 {approx = true} : vector<8x1xf32> -> vector<8x1xf32>
    %48 = vector.broadcast %47 : vector<8x1xf32> to vector<8x8xf32>
    %49 = arith.mulf %46, %48 : vector<8x8xf32>
    %50 = arith.truncf %49 : vector<8x8xf32> to vector<8x8xbf16>
    %c1_39 = arith.constant 1 : index
    %c0_40 = arith.constant 0 : index
    %c0_41 = arith.constant 0 : index
    %51 = vector.load %arg11[%c1_39, %c0_40, %c0_41] : memref<4x8x32xbf16, #tpu.memory_space<vmem>>, vector<1x8x32xbf16>
    %52 = vector.shape_cast %51 : vector<1x8x32xbf16> to vector<8x32xbf16>
    %cst_42 = arith.constant dense<0.000000e+00> : vector<8x32xf32>
    %53 = tpu.matmul %50, %52, %cst_42 {dimension_numbers = #tpu.dot_dimension_numbers<[1], [0], [0], [1], [0, 0, 1, 1], [], []>} : vector<8x8xbf16>, vector<8x32xbf16>, vector<8x32xf32> -> vector<8x32xf32>
    %54 = arith.addf %29, %53 : vector<8x32xf32>
    %c0_43 = arith.constant 0 : index
    %c2 = arith.constant 2 : index
    %c0_44 = arith.constant 0 : index
    %c0_45 = arith.constant 0 : index
    %55 = vector.load %arg2[%c0_43, %c2, %c0_44, %c0_45] : memref<1x4x8x8xbf16, #tpu.memory_space<vmem>>, vector<1x1x8x8xbf16>
    %56 = vector.shape_cast %55 : vector<1x1x8x8xbf16> to vector<8x8xbf16>
    %c0_46 = arith.constant 0 : index
    %c2_47 = arith.constant 2 : index
    %c0_48 = arith.constant 0 : index
    %c0_49 = arith.constant 0 : index
    %57 = vector.load %arg3[%c0_46, %c2_47, %c0_48, %c0_49] : memref<1x4x8x8xbf16, #tpu.memory_space<vmem>>, vector<1x1x8x8xbf16>
    %58 = vector.shape_cast %57 : vector<1x1x8x8xbf16> to vector<8x8xbf16>
    %cst_50 = arith.constant dense<0.000000e+00> : vector<8x8xf32>
    %59 = tpu.matmul %56, %58, %cst_50 {dimension_numbers = #tpu.dot_dimension_numbers<[1], [0], [0], [1], [0, 0, 1, 1], [], []>} : vector<8x8xbf16>, vector<8x8xbf16>, vector<8x8xf32> -> vector<8x8xf32>
    %60 = arith.addf %59, %2 : vector<8x8xf32>
    %cst_51 = arith.constant dense<0xFF800000> : vector<8xf32>
    %61 = vector.multi_reduction <maximumf>, %60, %cst_51 [1] : vector<8x8xf32> to vector<8xf32>
    %62 = vector.shape_cast %61 : vector<8xf32> to vector<8x1xf32>
    %63 = vector.broadcast %62 : vector<8x1xf32> to vector<8x8xf32>
    %64 = arith.subf %60, %63 : vector<8x8xf32>
    %65 = math.exp %64 : vector<8x8xf32>
    %cst_52 = arith.constant dense<0.000000e+00> : vector<8xf32>
    %66 = vector.multi_reduction <add>, %65, %cst_52 [1] : vector<8x8xf32> to vector<8xf32>
    %67 = vector.shape_cast %66 : vector<8xf32> to vector<8x1xf32>
    %68 = arith.truncf %65 : vector<8x8xf32> to vector<8x8xbf16>
    %c0_53 = arith.constant 0 : index
    %c2_54 = arith.constant 2 : index
    %c0_55 = arith.constant 0 : index
    %c0_56 = arith.constant 0 : index
    %69 = vector.load %arg4[%c0_53, %c2_54, %c0_55, %c0_56] : memref<1x4x8x8xbf16, #tpu.memory_space<vmem>>, vector<1x1x8x8xbf16>
    %70 = vector.shape_cast %69 : vector<1x1x8x8xbf16> to vector<8x8xbf16>
    %cst_57 = arith.constant dense<0.000000e+00> : vector<8x8xf32>
    %71 = tpu.matmul %68, %70, %cst_57 {dimension_numbers = #tpu.dot_dimension_numbers<[1], [0], [0], [1], [0, 0, 1, 1], [], []>} : vector<8x8xbf16>, vector<8x8xbf16>, vector<8x8xf32> -> vector<8x8xf32>
    %72 = tpu.reciprocal %67 {approx = true} : vector<8x1xf32> -> vector<8x1xf32>
    %73 = vector.broadcast %72 : vector<8x1xf32> to vector<8x8xf32>
    %74 = arith.mulf %71, %73 : vector<8x8xf32>
    %75 = arith.truncf %74 : vector<8x8xf32> to vector<8x8xbf16>
    %c2_58 = arith.constant 2 : index
    %c0_59 = arith.constant 0 : index
    %c0_60 = arith.constant 0 : index
    %76 = vector.load %arg11[%c2_58, %c0_59, %c0_60] : memref<4x8x32xbf16, #tpu.memory_space<vmem>>, vector<1x8x32xbf16>
    %77 = vector.shape_cast %76 : vector<1x8x32xbf16> to vector<8x32xbf16>
    %cst_61 = arith.constant dense<0.000000e+00> : vector<8x32xf32>
    %78 = tpu.matmul %75, %77, %cst_61 {dimension_numbers = #tpu.dot_dimension_numbers<[1], [0], [0], [1], [0, 0, 1, 1], [], []>} : vector<8x8xbf16>, vector<8x32xbf16>, vector<8x32xf32> -> vector<8x32xf32>
    %79 = arith.addf %54, %78 : vector<8x32xf32>
    %c0_62 = arith.constant 0 : index
    %c3 = arith.constant 3 : index
    %c0_63 = arith.constant 0 : index
    %c0_64 = arith.constant 0 : index
    %80 = vector.load %arg2[%c0_62, %c3, %c0_63, %c0_64] : memref<1x4x8x8xbf16, #tpu.memory_space<vmem>>, vector<1x1x8x8xbf16>
    %81 = vector.shape_cast %80 : vector<1x1x8x8xbf16> to vector<8x8xbf16>
    %c0_65 = arith.constant 0 : index
    %c3_66 = arith.constant 3 : index
    %c0_67 = arith.constant 0 : index
    %c0_68 = arith.constant 0 : index
    %82 = vector.load %arg3[%c0_65, %c3_66, %c0_67, %c0_68] : memref<1x4x8x8xbf16, #tpu.memory_space<vmem>>, vector<1x1x8x8xbf16>
    %83 = vector.shape_cast %82 : vector<1x1x8x8xbf16> to vector<8x8xbf16>
    %cst_69 = arith.constant dense<0.000000e+00> : vector<8x8xf32>
    %84 = tpu.matmul %81, %83, %cst_69 {dimension_numbers = #tpu.dot_dimension_numbers<[1], [0], [0], [1], [0, 0, 1, 1], [], []>} : vector<8x8xbf16>, vector<8x8xbf16>, vector<8x8xf32> -> vector<8x8xf32>
    %85 = arith.addf %84, %2 : vector<8x8xf32>
    %cst_70 = arith.constant dense<0xFF800000> : vector<8xf32>
    %86 = vector.multi_reduction <maximumf>, %85, %cst_70 [1] : vector<8x8xf32> to vector<8xf32>
    %87 = vector.shape_cast %86 : vector<8xf32> to vector<8x1xf32>
    %88 = vector.broadcast %87 : vector<8x1xf32> to vector<8x8xf32>
    %89 = arith.subf %85, %88 : vector<8x8xf32>
    %90 = math.exp %89 : vector<8x8xf32>
    %cst_71 = arith.constant dense<0.000000e+00> : vector<8xf32>
    %91 = vector.multi_reduction <add>, %90, %cst_71 [1] : vector<8x8xf32> to vector<8xf32>
    %92 = vector.shape_cast %91 : vector<8xf32> to vector<8x1xf32>
    %93 = arith.truncf %90 : vector<8x8xf32> to vector<8x8xbf16>
    %c0_72 = arith.constant 0 : index
    %c3_73 = arith.constant 3 : index
    %c0_74 = arith.constant 0 : index
    %c0_75 = arith.constant 0 : index
    %94 = vector.load %arg4[%c0_72, %c3_73, %c0_74, %c0_75] : memref<1x4x8x8xbf16, #tpu.memory_space<vmem>>, vector<1x1x8x8xbf16>
    %95 = vector.shape_cast %94 : vector<1x1x8x8xbf16> to vector<8x8xbf16>
    %cst_76 = arith.constant dense<0.000000e+00> : vector<8x8xf32>
    %96 = tpu.matmul %93, %95, %cst_76 {dimension_numbers = #tpu.dot_dimension_numbers<[1], [0], [0], [1], [0, 0, 1, 1], [], []>} : vector<8x8xbf16>, vector<8x8xbf16>, vector<8x8xf32> -> vector<8x8xf32>
    %97 = tpu.reciprocal %92 {approx = true} : vector<8x1xf32> -> vector<8x1xf32>
    %98 = vector.broadcast %97 : vector<8x1xf32> to vector<8x8xf32>
    %99 = arith.mulf %96, %98 : vector<8x8xf32>
    %100 = arith.truncf %99 : vector<8x8xf32> to vector<8x8xbf16>
    %c3_77 = arith.constant 3 : index
    %c0_78 = arith.constant 0 : index
    %c0_79 = arith.constant 0 : index
    %101 = vector.load %arg11[%c3_77, %c0_78, %c0_79] : memref<4x8x32xbf16, #tpu.memory_space<vmem>>, vector<1x8x32xbf16>
    %102 = vector.shape_cast %101 : vector<1x8x32xbf16> to vector<8x32xbf16>
    %cst_80 = arith.constant dense<0.000000e+00> : vector<8x32xf32>
    %103 = tpu.matmul %100, %102, %cst_80 {dimension_numbers = #tpu.dot_dimension_numbers<[1], [0], [0], [1], [0, 0, 1, 1], [], []>} : vector<8x8xbf16>, vector<8x32xbf16>, vector<8x32xf32> -> vector<8x32xf32>
    %104 = arith.addf %79, %103 : vector<8x32xf32>
    %c0_81 = arith.constant 0 : index
    %c0_82 = arith.constant 0 : index
    %105 = vector.load %arg12[%c0_81, %c0_82] : memref<1x32xf32, #tpu.memory_space<vmem>>, vector<1x32xf32>
    %106 = vector.broadcast %105 : vector<1x32xf32> to vector<8x32xf32>
    %107 = arith.addf %104, %106 : vector<8x32xf32>
    %108 = arith.truncf %107 : vector<8x32xf32> to vector<8x32xbf16>
    %c0_83 = arith.constant 0 : index
    %c0_84 = arith.constant 0 : index
    %109 = vector.load %arg9[%c0_83, %c0_84] : memref<32x32xbf16, #tpu.memory_space<vmem>>, vector<32x32xbf16>
    %cst_85 = arith.constant dense<0.000000e+00> : vector<8x32xf32>
    %110 = tpu.matmul %108, %109, %cst_85 {dimension_numbers = #tpu.dot_dimension_numbers<[1], [0], [0], [1], [0, 0, 1, 1], [], []>} : vector<8x32xbf16>, vector<32x32xbf16>, vector<8x32xf32> -> vector<8x32xf32>
    %c0_86 = arith.constant 0 : index
    %c0_87 = arith.constant 0 : index
    %111 = vector.load %arg10[%c0_86, %c0_87] : memref<1x32xf32, #tpu.memory_space<vmem>>, vector<1x32xf32>
    %112 = vector.broadcast %111 : vector<1x32xf32> to vector<8x32xf32>
    %113 = arith.addf %110, %112 : vector<8x32xf32>
    %cst_88 = arith.constant 0.353553385 : f32
    %114 = vector.broadcast %cst_88 : f32 to vector<8x32xf32>
    %115 = arith.mulf %113, %114 : vector<8x32xf32>
    %116 = arith.truncf %115 : vector<8x32xf32> to vector<8x32xbf16>
    %117 = vector.extract_strided_slice %116 {offsets = [0, 0], sizes = [8, 8], strides = [1, 1]} : vector<8x32xbf16> to vector<8x8xbf16>
    %c0_89 = arith.constant 0 : index
    %c0_90 = arith.constant 0 : index
    %c0_91 = arith.constant 0 : index
    %c0_92 = arith.constant 0 : index
    %118 = vector.load %arg5[%c0_89, %c0_90, %c0_91, %c0_92] : memref<1x4x8x8xbf16, #tpu.memory_space<vmem>>, vector<1x1x8x8xbf16>
    %119 = vector.shape_cast %118 : vector<1x1x8x8xbf16> to vector<8x8xbf16>
    %cst_93 = arith.constant dense<0.000000e+00> : vector<8x8xf32>
    %120 = tpu.matmul %117, %119, %cst_93 {dimension_numbers = #tpu.dot_dimension_numbers<[1], [0], [0], [1], [0, 0, 1, 1], [], []>} : vector<8x8xbf16>, vector<8x8xbf16>, vector<8x8xf32> -> vector<8x8xf32>
    %121 = vector.broadcast %5 : vector<1x8xf32> to vector<8x8xf32>
    %122 = arith.addf %120, %121 : vector<8x8xf32>
    %cst_94 = arith.constant dense<0xFF800000> : vector<8xf32>
    %123 = vector.multi_reduction <maximumf>, %122, %cst_94 [1] : vector<8x8xf32> to vector<8xf32>
    %124 = vector.shape_cast %123 : vector<8xf32> to vector<8x1xf32>
    %125 = vector.broadcast %124 : vector<8x1xf32> to vector<8x8xf32>
    %126 = arith.subf %122, %125 : vector<8x8xf32>
    %127 = math.exp %126 : vector<8x8xf32>
    %cst_95 = arith.constant dense<0.000000e+00> : vector<8xf32>
    %128 = vector.multi_reduction <add>, %127, %cst_95 [1] : vector<8x8xf32> to vector<8xf32>
    %129 = vector.shape_cast %128 : vector<8xf32> to vector<8x1xf32>
    %130 = arith.truncf %127 : vector<8x8xf32> to vector<8x8xbf16>
    %c0_96 = arith.constant 0 : index
    %c0_97 = arith.constant 0 : index
    %c0_98 = arith.constant 0 : index
    %c0_99 = arith.constant 0 : index
    %131 = vector.load %arg6[%c0_96, %c0_97, %c0_98, %c0_99] : memref<1x4x8x8xbf16, #tpu.memory_space<vmem>>, vector<1x1x8x8xbf16>
    %132 = vector.shape_cast %131 : vector<1x1x8x8xbf16> to vector<8x8xbf16>
    %cst_100 = arith.constant dense<0.000000e+00> : vector<8x8xf32>
    %133 = tpu.matmul %130, %132, %cst_100 {dimension_numbers = #tpu.dot_dimension_numbers<[1], [0], [0], [1], [0, 0, 1, 1], [], []>} : vector<8x8xbf16>, vector<8x8xbf16>, vector<8x8xf32> -> vector<8x8xf32>
    %134 = tpu.reciprocal %129 {approx = true} : vector<8x1xf32> -> vector<8x1xf32>
    %135 = vector.broadcast %134 : vector<8x1xf32> to vector<8x8xf32>
    %136 = arith.mulf %133, %135 : vector<8x8xf32>
    %137 = arith.truncf %136 : vector<8x8xf32> to vector<8x8xbf16>
    %c0_101 = arith.constant 0 : index
    %c0_102 = arith.constant 0 : index
    %c0_103 = arith.constant 0 : index
    %138 = vector.load %arg11[%c0_101, %c0_102, %c0_103] : memref<4x8x32xbf16, #tpu.memory_space<vmem>>, vector<1x8x32xbf16>
    %139 = vector.shape_cast %138 : vector<1x8x32xbf16> to vector<8x32xbf16>
    %cst_104 = arith.constant dense<0.000000e+00> : vector<8x32xf32>
    %140 = tpu.matmul %137, %139, %cst_104 {dimension_numbers = #tpu.dot_dimension_numbers<[1], [0], [0], [1], [0, 0, 1, 1], [], []>} : vector<8x8xbf16>, vector<8x32xbf16>, vector<8x32xf32> -> vector<8x32xf32>
    %141 = vector.extract_strided_slice %116 {offsets = [0, 8], sizes = [8, 8], strides = [1, 1]} : vector<8x32xbf16> to vector<8x8xbf16>
    %c0_105 = arith.constant 0 : index
    %c1_106 = arith.constant 1 : index
    %c0_107 = arith.constant 0 : index
    %c0_108 = arith.constant 0 : index
    %142 = vector.load %arg5[%c0_105, %c1_106, %c0_107, %c0_108] : memref<1x4x8x8xbf16, #tpu.memory_space<vmem>>, vector<1x1x8x8xbf16>
    %143 = vector.shape_cast %142 : vector<1x1x8x8xbf16> to vector<8x8xbf16>
    %cst_109 = arith.constant dense<0.000000e+00> : vector<8x8xf32>
    %144 = tpu.matmul %141, %143, %cst_109 {dimension_numbers = #tpu.dot_dimension_numbers<[1], [0], [0], [1], [0, 0, 1, 1], [], []>} : vector<8x8xbf16>, vector<8x8xbf16>, vector<8x8xf32> -> vector<8x8xf32>
    %145 = vector.broadcast %5 : vector<1x8xf32> to vector<8x8xf32>
    %146 = arith.addf %144, %145 : vector<8x8xf32>
    %cst_110 = arith.constant dense<0xFF800000> : vector<8xf32>
    %147 = vector.multi_reduction <maximumf>, %146, %cst_110 [1] : vector<8x8xf32> to vector<8xf32>
    %148 = vector.shape_cast %147 : vector<8xf32> to vector<8x1xf32>
    %149 = vector.broadcast %148 : vector<8x1xf32> to vector<8x8xf32>
    %150 = arith.subf %146, %149 : vector<8x8xf32>
    %151 = math.exp %150 : vector<8x8xf32>
    %cst_111 = arith.constant dense<0.000000e+00> : vector<8xf32>
    %152 = vector.multi_reduction <add>, %151, %cst_111 [1] : vector<8x8xf32> to vector<8xf32>
    %153 = vector.shape_cast %152 : vector<8xf32> to vector<8x1xf32>
    %154 = arith.truncf %151 : vector<8x8xf32> to vector<8x8xbf16>
    %c0_112 = arith.constant 0 : index
    %c1_113 = arith.constant 1 : index
    %c0_114 = arith.constant 0 : index
    %c0_115 = arith.constant 0 : index
    %155 = vector.load %arg6[%c0_112, %c1_113, %c0_114, %c0_115] : memref<1x4x8x8xbf16, #tpu.memory_space<vmem>>, vector<1x1x8x8xbf16>
    %156 = vector.shape_cast %155 : vector<1x1x8x8xbf16> to vector<8x8xbf16>
    %cst_116 = arith.constant dense<0.000000e+00> : vector<8x8xf32>
    %157 = tpu.matmul %154, %156, %cst_116 {dimension_numbers = #tpu.dot_dimension_numbers<[1], [0], [0], [1], [0, 0, 1, 1], [], []>} : vector<8x8xbf16>, vector<8x8xbf16>, vector<8x8xf32> -> vector<8x8xf32>
    %158 = tpu.reciprocal %153 {approx = true} : vector<8x1xf32> -> vector<8x1xf32>
    %159 = vector.broadcast %158 : vector<8x1xf32> to vector<8x8xf32>
    %160 = arith.mulf %157, %159 : vector<8x8xf32>
    %161 = arith.truncf %160 : vector<8x8xf32> to vector<8x8xbf16>
    %c1_117 = arith.constant 1 : index
    %c0_118 = arith.constant 0 : index
    %c0_119 = arith.constant 0 : index
    %162 = vector.load %arg11[%c1_117, %c0_118, %c0_119] : memref<4x8x32xbf16, #tpu.memory_space<vmem>>, vector<1x8x32xbf16>
    %163 = vector.shape_cast %162 : vector<1x8x32xbf16> to vector<8x32xbf16>
    %cst_120 = arith.constant dense<0.000000e+00> : vector<8x32xf32>
    %164 = tpu.matmul %161, %163, %cst_120 {dimension_numbers = #tpu.dot_dimension_numbers<[1], [0], [0], [1], [0, 0, 1, 1], [], []>} : vector<8x8xbf16>, vector<8x32xbf16>, vector<8x32xf32> -> vector<8x32xf32>
    %165 = arith.addf %140, %164 : vector<8x32xf32>
    %166 = vector.extract_strided_slice %116 {offsets = [0, 16], sizes = [8, 8], strides = [1, 1]} : vector<8x32xbf16> to vector<8x8xbf16>
    %c0_121 = arith.constant 0 : index
    %c2_122 = arith.constant 2 : index
    %c0_123 = arith.constant 0 : index
    %c0_124 = arith.constant 0 : index
    %167 = vector.load %arg5[%c0_121, %c2_122, %c0_123, %c0_124] : memref<1x4x8x8xbf16, #tpu.memory_space<vmem>>, vector<1x1x8x8xbf16>
    %168 = vector.shape_cast %167 : vector<1x1x8x8xbf16> to vector<8x8xbf16>
    %cst_125 = arith.constant dense<0.000000e+00> : vector<8x8xf32>
    %169 = tpu.matmul %166, %168, %cst_125 {dimension_numbers = #tpu.dot_dimension_numbers<[1], [0], [0], [1], [0, 0, 1, 1], [], []>} : vector<8x8xbf16>, vector<8x8xbf16>, vector<8x8xf32> -> vector<8x8xf32>
    %170 = vector.broadcast %5 : vector<1x8xf32> to vector<8x8xf32>
    %171 = arith.addf %169, %170 : vector<8x8xf32>
    %cst_126 = arith.constant dense<0xFF800000> : vector<8xf32>
    %172 = vector.multi_reduction <maximumf>, %171, %cst_126 [1] : vector<8x8xf32> to vector<8xf32>
    %173 = vector.shape_cast %172 : vector<8xf32> to vector<8x1xf32>
    %174 = vector.broadcast %173 : vector<8x1xf32> to vector<8x8xf32>
    %175 = arith.subf %171, %174 : vector<8x8xf32>
    %176 = math.exp %175 : vector<8x8xf32>
    %cst_127 = arith.constant dense<0.000000e+00> : vector<8xf32>
    %177 = vector.multi_reduction <add>, %176, %cst_127 [1] : vector<8x8xf32> to vector<8xf32>
    %178 = vector.shape_cast %177 : vector<8xf32> to vector<8x1xf32>
    %179 = arith.truncf %176 : vector<8x8xf32> to vector<8x8xbf16>
    %c0_128 = arith.constant 0 : index
    %c2_129 = arith.constant 2 : index
    %c0_130 = arith.constant 0 : index
    %c0_131 = arith.constant 0 : index
    %180 = vector.load %arg6[%c0_128, %c2_129, %c0_130, %c0_131] : memref<1x4x8x8xbf16, #tpu.memory_space<vmem>>, vector<1x1x8x8xbf16>
    %181 = vector.shape_cast %180 : vector<1x1x8x8xbf16> to vector<8x8xbf16>
    %cst_132 = arith.constant dense<0.000000e+00> : vector<8x8xf32>
    %182 = tpu.matmul %179, %181, %cst_132 {dimension_numbers = #tpu.dot_dimension_numbers<[1], [0], [0], [1], [0, 0, 1, 1], [], []>} : vector<8x8xbf16>, vector<8x8xbf16>, vector<8x8xf32> -> vector<8x8xf32>
    %183 = tpu.reciprocal %178 {approx = true} : vector<8x1xf32> -> vector<8x1xf32>
    %184 = vector.broadcast %183 : vector<8x1xf32> to vector<8x8xf32>
    %185 = arith.mulf %182, %184 : vector<8x8xf32>
    %186 = arith.truncf %185 : vector<8x8xf32> to vector<8x8xbf16>
    %c2_133 = arith.constant 2 : index
    %c0_134 = arith.constant 0 : index
    %c0_135 = arith.constant 0 : index
    %187 = vector.load %arg11[%c2_133, %c0_134, %c0_135] : memref<4x8x32xbf16, #tpu.memory_space<vmem>>, vector<1x8x32xbf16>
    %188 = vector.shape_cast %187 : vector<1x8x32xbf16> to vector<8x32xbf16>
    %cst_136 = arith.constant dense<0.000000e+00> : vector<8x32xf32>
    %189 = tpu.matmul %186, %188, %cst_136 {dimension_numbers = #tpu.dot_dimension_numbers<[1], [0], [0], [1], [0, 0, 1, 1], [], []>} : vector<8x8xbf16>, vector<8x32xbf16>, vector<8x32xf32> -> vector<8x32xf32>
    %190 = arith.addf %165, %189 : vector<8x32xf32>
    %191 = vector.extract_strided_slice %116 {offsets = [0, 24], sizes = [8, 8], strides = [1, 1]} : vector<8x32xbf16> to vector<8x8xbf16>
    %c0_137 = arith.constant 0 : index
    %c3_138 = arith.constant 3 : index
    %c0_139 = arith.constant 0 : index
    %c0_140 = arith.constant 0 : index
    %192 = vector.load %arg5[%c0_137, %c3_138, %c0_139, %c0_140] : memref<1x4x8x8xbf16, #tpu.memory_space<vmem>>, vector<1x1x8x8xbf16>
    %193 = vector.shape_cast %192 : vector<1x1x8x8xbf16> to vector<8x8xbf16>
    %cst_141 = arith.constant dense<0.000000e+00> : vector<8x8xf32>
    %194 = tpu.matmul %191, %193, %cst_141 {dimension_numbers = #tpu.dot_dimension_numbers<[1], [0], [0], [1], [0, 0, 1, 1], [], []>} : vector<8x8xbf16>, vector<8x8xbf16>, vector<8x8xf32> -> vector<8x8xf32>
    %195 = vector.broadcast %5 : vector<1x8xf32> to vector<8x8xf32>
    %196 = arith.addf %194, %195 : vector<8x8xf32>
    %cst_142 = arith.constant dense<0xFF800000> : vector<8xf32>
    %197 = vector.multi_reduction <maximumf>, %196, %cst_142 [1] : vector<8x8xf32> to vector<8xf32>
    %198 = vector.shape_cast %197 : vector<8xf32> to vector<8x1xf32>
    %199 = vector.broadcast %198 : vector<8x1xf32> to vector<8x8xf32>
    %200 = arith.subf %196, %199 : vector<8x8xf32>
    %201 = math.exp %200 : vector<8x8xf32>
    %cst_143 = arith.constant dense<0.000000e+00> : vector<8xf32>
    %202 = vector.multi_reduction <add>, %201, %cst_143 [1] : vector<8x8xf32> to vector<8xf32>
    %203 = vector.shape_cast %202 : vector<8xf32> to vector<8x1xf32>
    %204 = arith.truncf %201 : vector<8x8xf32> to vector<8x8xbf16>
    %c0_144 = arith.constant 0 : index
    %c3_145 = arith.constant 3 : index
    %c0_146 = arith.constant 0 : index
    %c0_147 = arith.constant 0 : index
    %205 = vector.load %arg6[%c0_144, %c3_145, %c0_146, %c0_147] : memref<1x4x8x8xbf16, #tpu.memory_space<vmem>>, vector<1x1x8x8xbf16>
    %206 = vector.shape_cast %205 : vector<1x1x8x8xbf16> to vector<8x8xbf16>
    %cst_148 = arith.constant dense<0.000000e+00> : vector<8x8xf32>
    %207 = tpu.matmul %204, %206, %cst_148 {dimension_numbers = #tpu.dot_dimension_numbers<[1], [0], [0], [1], [0, 0, 1, 1], [], []>} : vector<8x8xbf16>, vector<8x8xbf16>, vector<8x8xf32> -> vector<8x8xf32>
    %208 = tpu.reciprocal %203 {approx = true} : vector<8x1xf32> -> vector<8x1xf32>
    %209 = vector.broadcast %208 : vector<8x1xf32> to vector<8x8xf32>
    %210 = arith.mulf %207, %209 : vector<8x8xf32>
    %211 = arith.truncf %210 : vector<8x8xf32> to vector<8x8xbf16>
    %c3_149 = arith.constant 3 : index
    %c0_150 = arith.constant 0 : index
    %c0_151 = arith.constant 0 : index
    %212 = vector.load %arg11[%c3_149, %c0_150, %c0_151] : memref<4x8x32xbf16, #tpu.memory_space<vmem>>, vector<1x8x32xbf16>
    %213 = vector.shape_cast %212 : vector<1x8x32xbf16> to vector<8x32xbf16>
    %cst_152 = arith.constant dense<0.000000e+00> : vector<8x32xf32>
    %214 = tpu.matmul %211, %213, %cst_152 {dimension_numbers = #tpu.dot_dimension_numbers<[1], [0], [0], [1], [0, 0, 1, 1], [], []>} : vector<8x8xbf16>, vector<8x32xbf16>, vector<8x32xf32> -> vector<8x32xf32>
    %215 = arith.addf %190, %214 : vector<8x32xf32>
    %c0_153 = arith.constant 0 : index
    %c0_154 = arith.constant 0 : index
    %216 = vector.load %arg12[%c0_153, %c0_154] : memref<1x32xf32, #tpu.memory_space<vmem>>, vector<1x32xf32>
    %217 = vector.broadcast %216 : vector<1x32xf32> to vector<8x32xf32>
    %218 = arith.addf %215, %217 : vector<8x32xf32>
    %219 = arith.truncf %218 : vector<8x32xf32> to vector<8x32xbf16>
    %c0_155 = arith.constant 0 : index
    %c0_156 = arith.constant 0 : index
    %220 = vector.load %arg13[%c0_155, %c0_156] : memref<32x64xbf16, #tpu.memory_space<vmem>>, vector<32x64xbf16>
    %cst_157 = arith.constant dense<0.000000e+00> : vector<8x64xf32>
    %221 = tpu.matmul %219, %220, %cst_157 {dimension_numbers = #tpu.dot_dimension_numbers<[1], [0], [0], [1], [0, 0, 1, 1], [], []>} : vector<8x32xbf16>, vector<32x64xbf16>, vector<8x64xf32> -> vector<8x64xf32>
    %c0_158 = arith.constant 0 : index
    %c0_159 = arith.constant 0 : index
    %222 = vector.load %arg14[%c0_158, %c0_159] : memref<1x64xf32, #tpu.memory_space<vmem>>, vector<1x64xf32>
    %223 = vector.broadcast %222 : vector<1x64xf32> to vector<8x64xf32>
    %224 = arith.addf %221, %223 : vector<8x64xf32>
    %cst_160 = arith.constant 0.000000e+00 : f32
    %225 = vector.broadcast %cst_160 : f32 to vector<8x64xf32>
    %226 = arith.maximumf %224, %225 : vector<8x64xf32>
    %227 = arith.truncf %226 : vector<8x64xf32> to vector<8x64xbf16>
    %c0_161 = arith.constant 0 : index
    %c0_162 = arith.constant 0 : index
    %228 = vector.load %arg15[%c0_161, %c0_162] : memref<64x32xbf16, #tpu.memory_space<vmem>>, vector<64x32xbf16>
    %cst_163 = arith.constant dense<0.000000e+00> : vector<8x32xf32>
    %229 = tpu.matmul %227, %228, %cst_163 {dimension_numbers = #tpu.dot_dimension_numbers<[1], [0], [0], [1], [0, 0, 1, 1], [], []>} : vector<8x64xbf16>, vector<64x32xbf16>, vector<8x32xf32> -> vector<8x32xf32>
    %c0_164 = arith.constant 0 : index
    %c0_165 = arith.constant 0 : index
    %230 = vector.load %arg16[%c0_164, %c0_165] : memref<1x32xf32, #tpu.memory_space<vmem>>, vector<1x32xf32>
    %231 = vector.broadcast %230 : vector<1x32xf32> to vector<8x32xf32>
    %232 = arith.addf %229, %231 : vector<8x32xf32>
    %c0_166 = arith.constant 0 : index
    %c0_167 = arith.constant 0 : index
    %c0_168 = arith.constant 0 : index
    %233 = vector.load %arg17[%c0_166, %c0_167, %c0_168] : memref<1x8x32xf32, #tpu.memory_space<vmem>>, vector<1x8x32xf32>
    %234 = vector.shape_cast %233 : vector<1x8x32xf32> to vector<8x32xf32>
    %235 = vector.shape_cast %232 : vector<8x32xf32> to vector<1x8x32xf32>
    tpu.vector_store %arg17[%c0_166, %c0_167, %c0_168], %235 {strides = array<i32>} : memref<1x8x32xf32, #tpu.memory_space<vmem>>, vector<1x8x32xf32>,
    return
  }
  func.func @transform_0(%arg0: i32, %arg1: i32) -> (i32, i32, i32, i32) {
    %c0_i32 = arith.constant 0 : i32
    %c0_i32_0 = arith.constant 0 : i32
    %c0_i32_1 = arith.constant 0 : i32
    return %arg0, %c0_i32, %arg1, %c0_i32_0 : i32, i32, i32, i32
  }
  func.func @transform_1(%arg0: i32, %arg1: i32) -> (i32, i32, i32, i32) {
    %c0_i32 = arith.constant 0 : i32
    %c0_i32_0 = arith.constant 0 : i32
    %c0_i32_1 = arith.constant 0 : i32
    %c0_i32_2 = arith.constant 0 : i32
    return %arg0, %c0_i32, %c0_i32_0, %c0_i32_1 : i32, i32, i32, i32
  }
  func.func @transform_2(%arg0: i32, %arg1: i32) -> (i32, i32, i32, i32) {
    %c0_i32 = arith.constant 0 : i32
    %c0_i32_0 = arith.constant 0 : i32
    %c0_i32_1 = arith.constant 0 : i32
    %c0_i32_2 = arith.constant 0 : i32
    return %arg0, %c0_i32, %c0_i32_0, %c0_i32_1 : i32, i32, i32, i32
  }
  func.func @transform_3(%arg0: i32, %arg1: i32) -> (i32, i32, i32, i32) {
    %c0_i32 = arith.constant 0 : i32
    %c0_i32_0 = arith.constant 0 : i32
    %c0_i32_1 = arith.constant 0 : i32
    %c0_i32_2 = arith.constant 0 : i32
    return %arg0, %c0_i32, %c0_i32_0, %c0_i32_1 : i32, i32, i32, i32
  }
  func.func @transform_4(%arg0: i32, %arg1: i32) -> (i32, i32, i32, i32) {
    %c0_i32 = arith.constant 0 : i32
    %c0_i32_0 = arith.constant 0 : i32
    %c0_i32_1 = arith.constant 0 : i32
    %c0_i32_2 = arith.constant 0 : i32
    return %arg0, %c0_i32, %c0_i32_0, %c0_i32_1 : i32, i32, i32, i32
  }
  func.func @transform_5(%arg0: i32, %arg1: i32) -> (i32, i32, i32) {
    %c0_i32 = arith.constant 0 : i32
    %c0_i32_0 = arith.constant 0 : i32
    %c0_i32_1 = arith.constant 0 : i32
    return %arg0, %c0_i32, %c0_i32_0 : i32, i32, i32
  }
  func.func @transform_6(%arg0: i32, %arg1: i32) -> (i32, i32, i32) {
    %c0_i32 = arith.constant 0 : i32
    %c0_i32_0 = arith.constant 0 : i32
    return %arg0, %arg1, %c0_i32 : i32, i32, i32
  }
  func.func @transform_7(%arg0: i32, %arg1: i32) -> (i32, i32) {
    %c0_i32 = arith.constant 0 : i32
    %c0_i32_0 = arith.constant 0 : i32
    %c0_i32_1 = arith.constant 0 : i32
    return %c0_i32, %c0_i32_0 : i32, i32
  }
  func.func @transform_8(%arg0: i32, %arg1: i32) -> (i32, i32) {
    %c0_i32 = arith.constant 0 : i32
    %c0_i32_0 = arith.constant 0 : i32
    %c0_i32_1 = arith.constant 0 : i32
    return %c0_i32, %c0_i32_0 : i32, i32
  }
  func.func @transform_9(%arg0: i32, %arg1: i32) -> (i32, i32, i32) {
    %c0_i32 = arith.constant 0 : i32
    %c0_i32_0 = arith.constant 0 : i32
    %c0_i32_1 = arith.constant 0 : i32
    %c0_i32_2 = arith.constant 0 : i32
    return %c0_i32, %c0_i32_0, %c0_i32_1 : i32, i32, i32
  }
  func.func @transform_10(%arg0: i32, %arg1: i32) -> (i32, i32) {
    %c0_i32 = arith.constant 0 : i32
    %c0_i32_0 = arith.constant 0 : i32
    %c0_i32_1 = arith.constant 0 : i32
    return %c0_i32, %c0_i32_0 : i32, i32
  }
  func.func @transform_11(%arg0: i32, %arg1: i32) -> (i32, i32) {
    %c0_i32 = arith.constant 0 : i32
    %c0_i32_0 = arith.constant 0 : i32
    %c0_i32_1 = arith.constant 0 : i32
    return %c0_i32, %c0_i32_0 : i32, i32
  }
  func.func @transform_12(%arg0: i32, %arg1: i32) -> (i32, i32) {
    %c0_i32 = arith.constant 0 : i32
    %c0_i32_0 = arith.constant 0 : i32
    %c0_i32_1 = arith.constant 0 : i32
    return %c0_i32, %c0_i32_0 : i32, i32
  }
  func.func @transform_13(%arg0: i32, %arg1: i32) -> (i32, i32) {
    %c0_i32 = arith.constant 0 : i32
    %c0_i32_0 = arith.constant 0 : i32
    %c0_i32_1 = arith.constant 0 : i32
    return %c0_i32, %c0_i32_0 : i32, i32
  }
  func.func @transform_14(%arg0: i32, %arg1: i32) -> (i32, i32) {
    %c0_i32 = arith.constant 0 : i32
    %c0_i32_0 = arith.constant 0 : i32
    %c0_i32_1 = arith.constant 0 : i32
    return %c0_i32, %c0_i32_0 : i32, i32
  }
  func.func @transform_15(%arg0: i32, %arg1: i32) -> (i32, i32, i32) {
    %c0_i32 = arith.constant 0 : i32
    %c0_i32_0 = arith.constant 0 : i32
    return %arg0, %arg1, %c0_i32 : i32, i32, i32
  }
}

</mosaic_0001>

<bundles_post_ra>
// kernel: tpu_custom_call.1
= control target key start
LH: loop header
LB: loop body
LE: loop exit
PB: predicated region body
PF: predicated region fallthrough
CT: control target
= control target key end

     0   :  { %s4723_s0 = inlined_call_operand.hbm [shape: bf16[2,4,8,8], index: 0, kind: input, shape index: {}]   ;;  %s4724_s1 = inlined_call_operand.hbm [shape: bf16[2,4,8,8], index: 1, kind: input, shape index: {}]   ;;  %s4725_s2 = inlined_call_operand.hbm [shape: bf16[2,4,8,8], index: 2, kind: input, shape index: {}]   ;;  %s4726_s3 = inlined_call_operand.hbm [shape: bf16[2,4,8,8], index: 3, kind: input, shape index: {}]   ;;  %s4727_s4 = inlined_call_operand.hbm [shape: bf16[2,4,8,8], index: 4, kind: input, shape index: {}]   ;;  %s4728_s5 = inlined_call_operand.hbm [shape: bf16[2,1,8], index: 5, kind: input, shape index: {}]   ;;  %s4729_s6 = inlined_call_operand.hbm [shape: bf16[2,8,8], index: 6, kind: input, shape index: {}]   ;;  %s4730_s7 = inlined_call_operand.hbm [shape: bf16[32,32], index: 7, kind: input, shape index: {}]   ;;  %s4731_s8 = inlined_call_operand.hbm [shape: f32[1,32], index: 8, kind: input, shape index: {}]   ;;  %s4732_s9 = inlined_call_operand.hbm [shape: bf16[4,8,32], index: 9, kind: input, shape index: {}]   ;;  %s4733_s10 = inlined_call_operand.hbm [shape: f32[1,32], index: 10, kind: input, shape index: {}]   ;;  %s4734_s11 = inlined_call_operand.hbm [shape: bf16[32,64], index: 11, kind: input, shape index: {}]   ;;  %s4735_s12 = inlined_call_operand.hbm [shape: f32[1,64], index: 12, kind: input, shape index: {}]   ;;  %s4736_s13 = inlined_call_operand.hbm [shape: bf16[64,32], index: 13, kind: input, shape index: {}]   ;;  %s4737_s14 = inlined_call_operand.hbm [shape: f32[1,32], index: 14, kind: input, shape index: {}]   ;;  %s4738_s15 = inlined_call_operand.hbm [shape: f32[2,8,32], index: 15, kind: output, shape index: {}]  }
   0x1   :  { %4771 = sst [smem:[#allocation43_spill]] %s4723_s0 }
   0x2   :  { %4772 = sst [smem:[#allocation44_spill]] %s4724_s1 }
   0x3   :  { %4773 = sst [smem:[#allocation45_spill]] %s4725_s2 }
   0x4   :  { %4774 = sst [smem:[#allocation46_spill]] %s4726_s3 }
   0x5   :  { %4775 = sst [smem:[#allocation47_spill]] %s4727_s4 }
   0x6   :  { %4776 = sst [smem:[#allocation48_spill]] %s4728_s5 }
   0x7   :  { %4777 = sst [smem:[#allocation49_spill]] %s4729_s6 }
   0x8   :  { %4778 = sst [smem:[#allocation50_spill]] %s4730_s7 }
   0x9   :  { %4779 = sst [smem:[#allocation51_spill]] %s4731_s8 }
   0xa   :  { %4780 = sst [smem:[#allocation52_spill]] %s4732_s9 }
   0xb   :  { %4781 = sst [smem:[#allocation53_spill]] %s4734_s11 }
   0xc   :  { %4782 = sst [smem:[#allocation54_spill]] %s4735_s12 }
   0xd   :  { %4783 = sst [smem:[#allocation55_spill]] %s4736_s13 }
   0xe   :  { %4784 = sst [smem:[#allocation56_spill]] %s4737_s14 }
   0xf   :  { %4785 = sst [smem:[#allocation57_spill]] %s4738_s15 }
  0x10   :  { %20 = vsyncpa [#allocation3], 0 }
  0x11   :  { %22 = vsyncpa [#allocation3 + $0x1], 0 }
  0x12   :  { %23 = vsyncpa [#allocation6], 0 }
  0x13   :  { %25 = vsyncpa [#allocation6 + $0x1], 0 }
  0x14   :  { %26 = vsyncpa [#allocation9], 0 }
  0x15   :  { %28 = vsyncpa [#allocation9 + $0x1], 0 }
  0x16   :  { %29 = vsyncpa [#allocation12], 0 }
  0x17   :  { %31 = vsyncpa [#allocation12 + $0x1], 0 }
  0x18   :  { %32 = vsyncpa [#allocation15], 0 }
  0x19   :  { %33 = vsyncpa [#allocation18], 0 }
  0x1a   :  { %34 = vsyncpa [#allocation21], 0 }
  0x1b   :  { %35 = vsyncpa [#allocation24], 0 }
  0x1c   :  { %36 = vsyncpa [#allocation4], 0 }
  0x1d   :  { %38 = vsyncpa [#allocation4 + $0x1], 0  ;;  %s3863_s18 = smov 0   ;;  %s3865_s19 = smov 0  }
  0x1e   :  { %s3867_s20 = smov 0   ;;  %s3869_s21 = smov 0  }
  0x1f   :  { %s3871_s22 = smov 0   ;;  %s3873_s23 = smov 0  }
  0x20 LB: > { %4786 = sst [smem:[#allocation36_spill]] %s3746_s20  ;;  %s3894_s24 = sadd.s32 4294967295, %s3758_s23   ;;  %s3758_s23 = sphi %s3873_s23, %s44_s23   ;;  %s3754_s22 = sphi %s3871_s22, %s4855_s22   ;;  %s3750_s21 = sphi %s3869_s21, %s4854_s21   ;;  %s3746_s20 = sphi %s3867_s20, %s4850_s20   ;;  %s3742_s19 = sphi %s3865_s19, %s4853_s19   ;;  %s3738_s18 = sphi %s3863_s18, %s4852_s18  }
  0x21   : > { %4787 = sst [smem:[#allocation37_spill]] %s3750_s21  ;;  %p2656_p0 = scmp.ge.s32.totalorder %s3758_s23, 1 }
  0x22   : > { %4788 = sst [smem:[#allocation38_spill]] %s3758_s23  ;;  %p4747_p1 = scmp.eq.s32.totalorder %s3894_s24, 0 }
  0x23   : > { %p443_p2 = scmp.lt.s32.totalorder %s3758_s23, 3  ;;  %s3760_s26 = smov [#allocation14]  }
  0x24   : > { %s455_s27 = sshll.u32 %s3760_s26, 4  ;;  %s3761_s29 = smov [#allocation17]   ;;  %s3903_s27 = int_to_ptr.vmem [resolvable:$true] %s455_s27 }
  0x25   : > { %p3899_p3 = pnand %p2656_p0, %p443_p2  ;;  %s479_s30 = sshll.u32 %s3761_s29, 4  ;;  %s3914_s30 = int_to_ptr.vmem [resolvable:$true] %s479_s30 }
  0x26   : > { %s3762_s16 = smov [#allocation20]   ;;  %s4792_s7 = sld [smem:[#allocation50_spill]] }
  0x27   : > { %s4789_s25 = scalar_select %p3899_p3, 1, 0 }
  0x28   : > { %p3042_p4 = pneg %p3899_p3  ;;  %s3916_s17 = sshll.u32 %s3762_s16, 4  ;;  %s504_s17 = int_to_ptr.vmem [resolvable:$true] %s3916_s17 }
  0x29   : > { %4790 = sst [smem:[#allocation39_spill]] %s4789_s25 }
  0x2a   : > { %p3910_p6 = pnand %p3042_p4, %p4747_p1 }
  0x2c   : > { %s4791_s28 = scalar_select %p3910_p6, 1, 0 }
  0x2d   : > { %s3214_s21 = scalar_lea.hbm %s4792_s7, 256  ;;  %p3926_p8 = pneg %p3910_p6 }
  0x2e   : > { %p3215_p7 = scmp.ne.s32.totalorder %s4792_s7, %s3214_s21  ;;  %p3221_p11 = scmp.lt.u32.totalorder %s3214_s21, %s4792_s7 }
  0x2f   : > { %s4793_s4 = scalar_select %p3926_p8, 1, 0 }
  0x30   : > { %p3217_p9 = pnand %p3926_p8, %p3215_p7 }
  0x32   : > { %p3218_p10 = pneg %p3217_p9 }
  0x34   : > { %p3223_p12 = pnand %p3221_p11, %p3218_p10 }
  0x36   : > { %3226 = shalt.err (!%p3223_p12)
}
  0x37   : > { %s3227_s6 = scalar_lea.vmem %s3903_s27, 256  ;;  %p3235_p4 = scmp.lt.s32.totalorder %s3903_s27, %s3903_s27 }
  0x38   : > { %p3228_p13 = scmp.ne.s32.totalorder %s3903_s27, %s3227_s6  ;;  %p3236_p5 = scmp.lt.s32.totalorder %s3227_s6, %s3227_s6 }
  0x3a   : > { %p3230_p0 = pnand %p3228_p13, %p3926_p8  ;;  %p3237_p7 = por %p3236_p5, %p3235_p4 }
  0x3c   : > { %p3231_p2 = pneg %p3230_p0 }
  0x3e   : > { %p3238_p9 = pnand %p3237_p7, %p3231_p2 }
  0x40   : > { %3241 = shalt.err (!%p3238_p9)
}
  0x41   : > { %s4749_s15 = smov 64   ;;  %s4751_s21 = smov 4  }
  0x42   : > { %3045 = dma.hbm_to_vmem [thread:$0]  (!%p3910_p6), %s4792_s7, 256, %s3903_s27, [#allocation15], %s4749_s15, %s4749_s15, %s4751_s21  }
  0x43   : > { %s4794_s9 = sld [smem:[#allocation52_spill]] }
  0x49   : > { %s3242_s6 = scalar_lea.hbm %s4794_s9, 256 }
  0x4a   : > { %p3243_p5 = scmp.ne.s32.totalorder %s4794_s9, %s3242_s6  ;;  %p3249_p12 = scmp.lt.u32.totalorder %s3242_s6, %s4794_s9 }
  0x4c   : > { %p3245_p10 = pnand %p3243_p5, %p3926_p8 }
  0x4e   : > { %p3246_p11 = pneg %p3245_p10 }
  0x50   : > { %p3251_p13 = pnand %p3249_p12, %p3246_p11 }
  0x52   : > { %3254 = shalt.err (!%p3251_p13)
}
  0x53   : > { %s3255_s27 = scalar_lea.vmem %s3914_s30, 256  ;;  %p3263_p7 = scmp.lt.s32.totalorder %s3914_s30, %s3914_s30 }
  0x54   : > { %p3256_p0 = scmp.ne.s32.totalorder %s3914_s30, %s3255_s27  ;;  %p3264_p9 = scmp.lt.s32.totalorder %s3255_s27, %s3255_s27 }
  0x56   : > { %p3258_p2 = pnand %p3256_p0, %p3926_p8  ;;  %p3265_p5 = por %p3264_p9, %p3263_p7 }
  0x58   : > { %p3259_p4 = pneg %p3258_p2 }
  0x5a   : > { %p3266_p10 = pnand %p3265_p5, %p3259_p4 }
  0x5c   : > { %3269 = shalt.err (!%p3266_p10)
}
  0x5d   : > { %3051 = dma.hbm_to_vmem [thread:$0]  (!%p3910_p6), %s4794_s9, 256, %s3914_s30, [#allocation18], %s4749_s15, %s4749_s15, %s4751_s21  }
  0x5e   : > { %s4795_s11 = sld [smem:[#allocation53_spill]] }
  0x64   : > { %s3270_s25 = scalar_lea.hbm %s4795_s11, 256 }
  0x65   : > { %p3271_p11 = scmp.ne.s32.totalorder %s4795_s11, %s3270_s25  ;;  %p3277_p0 = scmp.lt.u32.totalorder %s3270_s25, %s4795_s11 }
  0x67   : > { %p3273_p12 = pnand %p3271_p11, %p3926_p8 }
  0x69   : > { %p3274_p13 = pneg %p3273_p12 }
  0x6b   : > { %p3279_p2 = pnand %p3277_p0, %p3274_p13 }
  0x6d   : > { %3282 = shalt.err (!%p3279_p2)
}
  0x6e   : > { %s3283_s27 = scalar_lea.vmem %s504_s17, 256  ;;  %p3291_p5 = scmp.lt.s32.totalorder %s504_s17, %s504_s17 }
  0x6f   : > { %p3284_p4 = scmp.ne.s32.totalorder %s504_s17, %s3283_s27  ;;  %p3292_p10 = scmp.lt.s32.totalorder %s3283_s27, %s3283_s27 }
  0x71   : > { %p3286_p7 = pnand %p3284_p4, %p3926_p8  ;;  %p3293_p1 = por %p3292_p10, %p3291_p5 }
  0x73   : > { %p3287_p9 = pneg %p3286_p7 }
  0x75   : > { %p3294_p3 = pnand %p3293_p1, %p3287_p9 }
  0x77   : > { %3297 = shalt.err (!%p3294_p3)
}
  0x78   : > { %3057 = dma.hbm_to_vmem [thread:$0]  (!%p3910_p6), %s4795_s11, 256, %s504_s17, [#allocation21], %s4749_s15, %s4749_s15, %s4751_s21  }
  0x79   : > { %s3765_s2 = smov [#allocation23]   ;;  %s4796_s13 = sld [smem:[#allocation55_spill]] }
  0x7a   : > { %s527_s12 = sshll.u32 %s3765_s2, 4  ;;  %s528_s12 = int_to_ptr.vmem [resolvable:$true] %s527_s12 }
  0x7f   : > { %s3298_s26 = scalar_lea.hbm %s4796_s13, 512 }
  0x80   : > { %p3299_p1 = scmp.ne.s32.totalorder %s4796_s13, %s3298_s26  ;;  %p3305_p12 = scmp.lt.u32.totalorder %s3298_s26, %s4796_s13 }
  0x82   : > { %p3301_p3 = pnand %p3299_p1, %p3926_p8 }
  0x84   : > { %p3302_p11 = pneg %p3301_p3 }
  0x86   : > { %p3307_p13 = pnand %p3305_p12, %p3302_p11 }
  0x88   : > { %3310 = shalt.err (!%p3307_p13)
}
  0x89   : > { %s3311_s17 = scalar_lea.vmem %s528_s12, 512  ;;  %p3319_p7 = scmp.lt.s32.totalorder %s528_s12, %s528_s12 }
  0x8a   : > { %p3312_p0 = scmp.ne.s32.totalorder %s528_s12, %s3311_s17  ;;  %p3320_p9 = scmp.lt.s32.totalorder %s3311_s17, %s3311_s17 }
  0x8c   : > { %p3314_p2 = pnand %p3312_p0, %p3926_p8  ;;  %p3321_p5 = por %p3320_p9, %p3319_p7 }
  0x8e   : > { %p3315_p4 = pneg %p3314_p2 }
  0x90   : > { %p3322_p10 = pnand %p3321_p5, %p3315_p4 }
  0x92   : > { %3325 = shalt.err (!%p3322_p10)
}
  0x93   : > { %3063 = dma.hbm_to_vmem [thread:$0]  (!%p3910_p6), %s4796_s13, 512, %s528_s12, [#allocation24], %s4749_s15, %s4749_s15, %s4751_s21  }
  0x94   : > { %s2655_s2 = sadd.s32 4294967294, %s3758_s23   ;;  %s56_s14 = sadd.s32 1, %s3754_s22 }
  0x95   : > { %p58_p1 = scmp.ge.s32.totalorder %s56_s14, 2  ;;  %s65_s25 = sadd.s32 1, %s3746_s20 }
  0x96   : > { %p72_p3 = scmp.ne.s32.totalorder %s3746_s20, %s3742_s19  ;;  %p73_p11 = scmp.eq.s32.totalorder %s3758_s23, 0 }
  0x97   : > { %s4857_s14 = smov (%p58_p1, %s56_s14), 0  ;;  %p78_p13 = scmp.ne.s32.totalorder %s3742_s19, %s3738_s18 }
  0x98   : > { %4797 = sst [smem:[#allocation40_spill]] %s4857_s14  ;;  %p4027_p12 = por %p73_p11, %p72_p3 }
  0x99   : > { %s60_s12 = ssub.s32 %s3754_s22, %s4857_s14  ;;  %p430_p0 = scmp.eq.s32.totalorder %s3894_s24, 1 }
  0x9a   : > { %p63_p2 = scmp.eq.s32.totalorder %s60_s12, 0  ;;  %p4799_p4 = scmp.eq.s32.totalorder %s3894_s24, 0 }
  0x9b   : > { %p4042_p9 = por %p430_p0, %p72_p3  ;;  %p436_p5 = scmp.eq.s32.totalorder %s2655_s2, 1 }
  0x9c   : > { %p4038_p7 = por %p4799_p4, %p78_p13  ;;  %p3101_p1 = scmp.lt.s32.totalorder %s3758_s23, 2 }
  0x9d   : > { %s4801_s16 = scalar_select %p4042_p9, 1, 0 }
  0x9e   : > { %s4800_s29 = scalar_select %p4038_p7, 1, 0 }
  0x9f   : > { %s4047_s6 = scalar_select %p63_p2, %s3746_s20, %s65_s25  }
  0xa0   : > { %p4049_p10 = por %p436_p5, %p78_p13  ;;  %s4055_s17 = sand.u32 1, %s3746_s20  }
  0xa1   : > { %4802 = sst [smem:[#allocation41_spill]] %s4047_s6  ;;  %s4058_s30 = sshll.u32 %s3754_s22, 8 }
  0xa2   : > { %s4803_s27 = scalar_select %p4049_p10, 1, 0 }
  0xa3   : > { %s4061_s0 = sshll.u32 %s4055_s17, 4  ;;  %p4065_p3 = pnand %p3101_p1, %p4027_p12 }
  0xa4   : > { %4804 = sst [smem:[#allocation42_spill]] %s4803_s27  ;;  %s4070_s2 = sand.u32 1, %s3758_s23  }
  0xa5   : > { %s4805_s12 = scalar_select %p4065_p3, 1, 0 }
  0xa6   : > { %s4806_s1 = sld [smem:[#allocation44_spill]]  ;;  %s578_s7 = scalar_lea.vmem [#allocation5], %s4061_s0 }
  0xa7   : > { %s585_s26 = sshll.u32 %s578_s7, 4  ;;  %p4086_p12 = pneg %p4065_p3  ;;  %s4079_s26 = int_to_ptr.vmem [resolvable:$true] %s585_s26 }
  0xa9   : > { %s4807_s13 = scalar_select %p4086_p12, 1, 0 }
  0xac   : > { %s4076_s21 = scalar_lea.hbm %s4806_s1, %s4058_s30  ;;  %s3331_s14 = scalar_lea.hbm %s4806_s1, 512 }
  0xad   : > { %s3326_s11 = scalar_lea.hbm %s4076_s21, 256  ;;  %p3332_p2 = scmp.lt.u32.totalorder %s4076_s21, %s4806_s1 }
  0xae   : > { %p3327_p11 = scmp.ne.s32.totalorder %s4076_s21, %s3326_s11  ;;  %p3333_p4 = scmp.lt.u32.totalorder %s3331_s14, %s3326_s11 }
  0xaf   : > { %p3335_p1 = scmp.lt.u32.totalorder %s3326_s11, %s4076_s21 }
  0xb0   : > { %p3329_p13 = pnand %p4086_p12, %p3327_p11  ;;  %p3334_p5 = por %p3333_p4, %p3332_p2 }
  0xb2   : > { %p3330_p0 = pneg %p3329_p13  ;;  %p3336_p10 = por %p3335_p1, %p3334_p5 }
  0xb4   : > { %p3337_p9 = pnand %p3336_p10, %p3330_p0 }
  0xb6   : > { %3340 = shalt.err (!%p3337_p9)
}
  0xb7   : > { %s3341_s9 = scalar_lea.vmem %s4079_s26, 256  ;;  %s3766_s15 = smov [#allocation5]  }
  0xb8   : > { %p3342_p11 = scmp.ne.s32.totalorder %s4079_s26, %s3341_s9  ;;  %s3346_s25 = sshll.u32 %s3766_s15, 4  ;;  %s3347_s25 = int_to_ptr.vmem [resolvable:$false] %s3346_s25 }
  0xb9   : > { %s3348_s6 = scalar_lea.vmem %s3347_s25, 512  ;;  %p3349_p6 = scmp.lt.s32.totalorder %s4079_s26, %s3347_s25 }
  0xba   : > { %p3344_p13 = pnand %p3342_p11, %p4086_p12  ;;  %p3350_p8 = scmp.lt.s32.totalorder %s3348_s6, %s3341_s9 }
  0xbc   : > { %p3345_p7 = pneg %p3344_p13  ;;  %p3351_p2 = por %p3350_p8, %p3349_p6 }
  0xbe   : > { %p3352_p4 = pnand %p3351_p2, %p3345_p7 }
  0xc0   : > { %3355 = shalt.err (!%p3352_p4)
}
  0xc1   : > { %s4808_s11 = smov 4   ;;  %s4809_s14 = smov 64  }
  0xc2   : > { %s4810_s7 = scalar_lea.sflag [#allocation6], %s4070_s2  ;;  %s4811_s3 = sld [smem:[#allocation46_spill]] }
  0xc3   : > { %3073 = dma.hbm_to_vmem [thread:$0]  (!%p4065_p3), %s4076_s21, 256, %s4079_s26, %s4810_s7, %s4809_s14, %s4809_s14, %s4808_s11  }
  0xc4   : > { %s620_s6 = scalar_lea.vmem [#allocation8], %s4061_s0  ;;  %s4763_s20 = scalar_lea.sflag [#allocation9], %s4070_s2 }
  0xc5   : > { %s627_s1 = sshll.u32 %s620_s6, 4  ;;  %s4121_s1 = int_to_ptr.vmem [resolvable:$true] %s627_s1 }
  0xc8   : > { %s4118_s9 = scalar_lea.hbm %s4811_s3, %s4058_s30  ;;  %s3361_s7 = scalar_lea.hbm %s4811_s3, 512 }
  0xc9   : > { %s3356_s23 = scalar_lea.hbm %s4118_s9, 256  ;;  %p3362_p9 = scmp.lt.u32.totalorder %s4118_s9, %s4811_s3 }
  0xca   : > { %p3357_p6 = scmp.ne.s32.totalorder %s4118_s9, %s3356_s23  ;;  %p3363_p10 = scmp.lt.u32.totalorder %s3361_s7, %s3356_s23 }
  0xcb   : > { %p3365_p5 = scmp.lt.u32.totalorder %s3356_s23, %s4118_s9 }
  0xcc   : > { %p3359_p8 = pnand %p3357_p6, %p4086_p12  ;;  %p3364_p0 = por %p3363_p10, %p3362_p9 }
  0xce   : > { %p3360_p7 = pneg %p3359_p8  ;;  %p3366_p1 = por %p3365_p5, %p3364_p0 }
  0xd0   : > { %p3367_p11 = pnand %p3366_p1, %p3360_p7 }
  0xd2   : > { %3370 = shalt.err (!%p3367_p11)
}
  0xd3   : > { %s3371_s6 = scalar_lea.vmem %s4121_s1, 256  ;;  %s3767_s21 = smov [#allocation8]  }
  0xd4   : > { %p3372_p13 = scmp.ne.s32.totalorder %s4121_s1, %s3371_s6  ;;  %s3376_s26 = sshll.u32 %s3767_s21, 4  ;;  %s3377_s26 = int_to_ptr.vmem [resolvable:$false] %s3376_s26 }
  0xd5   : > { %s3378_s15 = scalar_lea.vmem %s3377_s26, 512  ;;  %p3379_p6 = scmp.lt.s32.totalorder %s4121_s1, %s3377_s26 }
  0xd6   : > { %p3374_p2 = pnand %p3372_p13, %p4086_p12  ;;  %p3380_p8 = scmp.lt.s32.totalorder %s3378_s15, %s3371_s6 }
  0xd8   : > { %p3375_p4 = pneg %p3374_p2  ;;  %p3381_p9 = por %p3380_p8, %p3379_p6 }
  0xda   : > { %p3382_p10 = pnand %p3381_p9, %p3375_p4 }
  0xdc   : > { %3385 = shalt.err (!%p3382_p10)
}
  0xdd   : > { %3079 = dma.hbm_to_vmem [thread:$0]  (!%p4065_p3), %s4118_s9, 256, %s4121_s1, %s4763_s20, %s4809_s14, %s4809_s14, %s4808_s11  }
  0xde   : > { %s2681_s23 = sshll.u32 %s3754_s22, 4  ;;  %s661_s7 = scalar_lea.vmem [#allocation11], %s4055_s17 }
  0xdf   : > { %s668_s25 = sshll.u32 %s661_s7, 4  ;;  %s4812_s5 = sld [smem:[#allocation48_spill]]  ;;  %s669_s25 = int_to_ptr.vmem [resolvable:$true] %s668_s25 }
  0xe0   : > { %s4767_s15 = scalar_lea.sflag [#allocation12], %s4070_s2 }
  0xe5   : > { %s4155_s26 = scalar_lea.hbm %s4812_s5, %s2681_s23  ;;  %s3391_s7 = scalar_lea.hbm %s4812_s5, 32 }
  0xe6   : > { %s3386_s3 = scalar_lea.hbm %s4155_s26, 16  ;;  %p3392_p1 = scmp.lt.u32.totalorder %s4155_s26, %s4812_s5 }
  0xe7   : > { %p3387_p7 = scmp.ne.s32.totalorder %s4155_s26, %s3386_s3  ;;  %p3393_p11 = scmp.lt.u32.totalorder %s3391_s7, %s3386_s3 }
  0xe8   : > { %p3395_p2 = scmp.lt.u32.totalorder %s3386_s3, %s4155_s26 }
  0xe9   : > { %p3389_p0 = pnand %p3387_p7, %p4086_p12  ;;  %p3394_p13 = por %p3393_p11, %p3392_p1 }
  0xeb   : > { %p3390_p5 = pneg %p3389_p0  ;;  %p3396_p4 = por %p3395_p2, %p3394_p13 }
  0xed   : > { %p3397_p6 = pnand %p3396_p4, %p3390_p5 }
  0xef   : > { %3400 = shalt.err (!%p3397_p6)
}
  0xf0   : > { %s3401_s23 = scalar_lea.vmem %s669_s25, 16  ;;  %s3768_s6 = smov [#allocation11]  }
  0xf1   : > { %p3402_p8 = scmp.ne.s32.totalorder %s669_s25, %s3401_s23  ;;  %s3406_s21 = sshll.u32 %s3768_s6, 4  ;;  %s3407_s21 = int_to_ptr.vmem [resolvable:$false] %s3406_s21 }
  0xf2   : > { %s3408_s1 = scalar_lea.vmem %s3407_s21, 32  ;;  %p3409_p7 = scmp.lt.s32.totalorder %s669_s25, %s3407_s21 }
  0xf3   : > { %p3404_p9 = pnand %p3402_p8, %p4086_p12  ;;  %p3410_p0 = scmp.lt.s32.totalorder %s3408_s1, %s3401_s23 }
  0xf5   : > { %p3405_p10 = pneg %p3404_p9  ;;  %p3411_p3 = por %p3410_p0, %p3409_p7 }
  0xf7   : > { %p3412_p1 = pnand %p3411_p3, %p3405_p10 }
  0xf9   : > { %3415 = shalt.err (!%p3412_p1)
}
  0xfa   : > { %p4813_p11 = scmp.ne.s32.totalorder %s4805_s12, 0  ;;  %s3769_s3 = smov [#allocation16]  }
  0xfb   : > { %s469_s20 = sshll.u32 %s3769_s3, 4  ;;  %s3770_s27 = smov [#allocation19]   ;;  %s470_s20 = int_to_ptr.vmem [resolvable:$true] %s469_s20 }
  0xfc   : > { %3085 = dma.hbm_to_vmem [thread:$0]  (!%p4813_p11), %s4155_s26, 16, %s669_s25, %s4767_s15  }
  0xfd   : > { %s493_s9 = sshll.u32 %s3770_s27, 4  ;;  %s4814_s8 = sld [smem:[#allocation51_spill]]  ;;  %s4177_s9 = int_to_ptr.vmem [resolvable:$true] %s493_s9 }
  0xfe   : > { %p4815_p5 = scmp.ne.s32.totalorder %s4793_s4, 0 }
 0x103   : > { %s3416_s23 = scalar_lea.hbm %s4814_s8, 16 }
 0x104   : > { %p3417_p3 = scmp.ne.s32.totalorder %s4814_s8, %s3416_s23  ;;  %p3423_p4 = scmp.lt.u32.totalorder %s3416_s23, %s4814_s8 }
 0x106   : > { %p3419_p13 = pnand %p3417_p3, %p4815_p5 }
 0x108   : > { %p3420_p2 = pneg %p3419_p13 }
 0x10a   : > { %p3425_p6 = pnand %p3423_p4, %p3420_p2 }
 0x10c   : > { %3428 = shalt.err (!%p3425_p6)
}
 0x10d   : > { %s3429_s26 = scalar_lea.vmem %s470_s20, 16  ;;  %s3436_s3 = scalar_lea.vmem %s470_s20, 32 }
 0x10e   : > { %p3430_p8 = scmp.ne.s32.totalorder %s470_s20, %s3429_s26  ;;  %p3437_p7 = scmp.lt.s32.totalorder %s470_s20, %s470_s20 }
 0x10f   : > { %p3438_p0 = scmp.lt.s32.totalorder %s3436_s3, %s3429_s26 }
 0x110   : > { %p3432_p9 = pnand %p3430_p8, %p4815_p5 }
 0x111   : > { %p3439_p1 = por %p3438_p0, %p3437_p7 }
 0x112   : > { %p3433_p10 = pneg %p3432_p9 }
 0x114   : > { %p3440_p11 = pnand %p3439_p1, %p3433_p10 }
 0x116   : > { %3443 = shalt.err (!%p3440_p11)
}
 0x117   : > { %p4816_p3 = scmp.ne.s32.totalorder %s4791_s28, 0  ;;  %s3444_s23 = scalar_lea.hbm %s4733_s10, 16 }
 0x118   : > { %p3445_p13 = scmp.ne.s32.totalorder %s4733_s10, %s3444_s23  ;;  %p3451_p11 = scmp.lt.u32.totalorder %s3444_s23, %s4733_s10 }
 0x119   : > { %3048 = dma.hbm_to_vmem [thread:$0]  (!%p4816_p3), %s4814_s8, 16, %s470_s20, [#allocation15]  }
 0x11a   : > { %p3447_p2 = pnand %p3445_p13, %p4815_p5 }
 0x11c   : > { %p3448_p4 = pneg %p3447_p2 }
 0x11e   : > { %p3453_p6 = pnand %p3451_p11, %p3448_p4 }
 0x120   : > { %3456 = shalt.err (!%p3453_p6)
}
 0x121   : > { %s3457_s20 = scalar_lea.vmem %s4177_s9, 16  ;;  %s3464_s3 = scalar_lea.vmem %s4177_s9, 32 }
 0x122   : > { %p3458_p8 = scmp.ne.s32.totalorder %s4177_s9, %s3457_s20  ;;  %p3465_p7 = scmp.lt.s32.totalorder %s4177_s9, %s4177_s9 }
 0x123   : > { %p3466_p0 = scmp.lt.s32.totalorder %s3464_s3, %s3457_s20 }
 0x124   : > { %p3460_p9 = pnand %p3458_p8, %p4815_p5 }
 0x125   : > { %p3467_p1 = por %p3466_p0, %p3465_p7 }
 0x126   : > { %p3461_p10 = pneg %p3460_p9 }
 0x128   : > { %p3468_p13 = pnand %p3467_p1, %p3461_p10 }
 0x12a   : > { %3471 = shalt.err (!%p3468_p13)
}
 0x12b   : > { %3054 = dma.hbm_to_vmem [thread:$0]  (!%p4816_p3), %s4733_s10, 16, %s4177_s9, [#allocation18]  }
 0x12c   : > { %s3771_s5 = smov [#allocation22]   ;;  %s3772_s23 = smov [#allocation25]  }
 0x12d   : > { %s517_s6 = sshll.u32 %s3771_s5, 4  ;;  %s541_s21 = sshll.u32 %s3772_s23, 4  ;;  %s518_s6 = int_to_ptr.vmem [resolvable:$true] %s517_s6  ;;  %s4221_s21 = int_to_ptr.vmem [resolvable:$true] %s541_s21 }
 0x12e   : > { %s4817_s26 = sld [smem:[#allocation54_spill]] }
 0x134   : > { %s3472_s20 = scalar_lea.hbm %s4817_s26, 16 }
 0x135   : > { %p3473_p2 = scmp.ne.s32.totalorder %s4817_s26, %s3472_s20  ;;  %p3479_p6 = scmp.lt.u32.totalorder %s3472_s20, %s4817_s26 }
 0x137   : > { %p3475_p4 = pnand %p3473_p2, %p4815_p5 }
 0x139   : > { %p3476_p11 = pneg %p3475_p4 }
 0x13b   : > { %p3481_p8 = pnand %p3479_p6, %p3476_p11 }
 0x13d   : > { %3484 = shalt.err (!%p3481_p8)
}
 0x13e   : > { %s3485_s7 = scalar_lea.vmem %s518_s6, 16  ;;  %s3492_s5 = scalar_lea.vmem %s518_s6, 32 }
 0x13f   : > { %p3486_p9 = scmp.ne.s32.totalorder %s518_s6, %s3485_s7  ;;  %p3493_p0 = scmp.lt.s32.totalorder %s518_s6, %s518_s6 }
 0x140   : > { %p3494_p1 = scmp.lt.s32.totalorder %s3492_s5, %s3485_s7 }
 0x141   : > { %p3488_p10 = pnand %p3486_p9, %p4815_p5 }
 0x142   : > { %p3495_p13 = por %p3494_p1, %p3493_p0 }
 0x143   : > { %p3489_p7 = pneg %p3488_p10 }
 0x145   : > { %p3496_p12 = pnand %p3495_p13, %p3489_p7 }
 0x147   : > { %3499 = shalt.err (!%p3496_p12)
}
 0x148   : > { %3060 = dma.hbm_to_vmem [thread:$0]  (!%p4816_p3), %s4817_s26, 16, %s518_s6, [#allocation21]  }
 0x149   : > { %s4818_s20 = sld [smem:[#allocation56_spill]] }
 0x14f   : > { %s4819_s3 = smov %s4818_s20  ;;  %s3500_s27 = scalar_lea.hbm %s4818_s20, 16 }
 0x150   : > { %p3501_p2 = scmp.ne.s32.totalorder %s4819_s3, %s3500_s27  ;;  %p3507_p12 = scmp.lt.u32.totalorder %s3500_s27, %s4819_s3 }
 0x152   : > { %p3503_p4 = pnand %p3501_p2, %p4815_p5 }
 0x154   : > { %p3504_p11 = pneg %p3503_p4 }
 0x156   : > { %p3509_p6 = pnand %p3507_p12, %p3504_p11 }
 0x158   : > { %3512 = shalt.err (!%p3509_p6)
}
 0x159   : > { %s3513_s6 = scalar_lea.vmem %s4221_s21, 16  ;;  %s3520_s8 = scalar_lea.vmem %s4221_s21, 32 }
 0x15a   : > { %p3514_p8 = scmp.ne.s32.totalorder %s4221_s21, %s3513_s6  ;;  %p3521_p7 = scmp.lt.s32.totalorder %s4221_s21, %s4221_s21 }
 0x15b   : > { %p3522_p0 = scmp.lt.s32.totalorder %s3520_s8, %s3513_s6 }
 0x15c   : > { %p3516_p9 = pnand %p3514_p8, %p4815_p5 }
 0x15d   : > { %p3523_p1 = por %p3522_p0, %p3521_p7 }
 0x15e   : > { %p3517_p10 = pneg %p3516_p9 }
 0x160   : > { %p3524_p13 = pnand %p3523_p1, %p3517_p10 }
 0x162   : > { %3527 = shalt.err (!%p3524_p13)
}
 0x163   : > { %3066 = dma.hbm_to_vmem [thread:$0]  (!%p4816_p3), %s4819_s3, 16, %s4221_s21, [#allocation24]  }
 0x164   : > { %s4820_s25 = sld [smem:[#allocation43_spill]]  ;;  %s556_s27 = scalar_lea.vmem [#allocation2], %s4061_s0 }
 0x165   : > { %s564_s28 = sshll.u32 %s556_s27, 4  ;;  %s553_s9 = scalar_lea.sflag [#allocation3], %s4055_s17  ;;  %s4272_s28 = int_to_ptr.vmem [resolvable:$true] %s564_s28 }
 0x166   : > { %p4821_p2 = scmp.ne.s32.totalorder %s4807_s13, 0 }
 0x16a   : > { %s4269_s20 = scalar_lea.hbm %s4820_s25, %s4058_s30  ;;  %s3533_s6 = scalar_lea.hbm %s4820_s25, 512 }
 0x16b   : > { %s3528_s7 = scalar_lea.hbm %s4269_s20, 256  ;;  %p3534_p3 = scmp.lt.u32.totalorder %s4269_s20, %s4820_s25 }
 0x16c   : > { %p3529_p5 = scmp.ne.s32.totalorder %s4269_s20, %s3528_s7  ;;  %p3535_p12 = scmp.lt.u32.totalorder %s3533_s6, %s3528_s7 }
 0x16d   : > { %p3537_p8 = scmp.lt.u32.totalorder %s3528_s7, %s4269_s20 }
 0x16e   : > { %p3531_p4 = pnand %p3529_p5, %p4821_p2  ;;  %p3536_p6 = por %p3535_p12, %p3534_p3 }
 0x170   : > { %p3532_p11 = pneg %p3531_p4  ;;  %p3538_p9 = por %p3537_p8, %p3536_p6 }
 0x172   : > { %p3539_p10 = pnand %p3538_p9, %p3532_p11 }
 0x174   : > { %3542 = shalt.err (!%p3539_p10)
}
 0x175   : > { %s3543_s23 = scalar_lea.vmem %s4272_s28, 256  ;;  %s3773_s4 = smov [#allocation2]  }
 0x176   : > { %p3544_p7 = scmp.ne.s32.totalorder %s4272_s28, %s3543_s23  ;;  %s3548_s1 = sshll.u32 %s3773_s4, 4  ;;  %s3549_s1 = int_to_ptr.vmem [resolvable:$false] %s3548_s1 }
 0x177   : > { %s3550_s27 = scalar_lea.vmem %s3549_s1, 512  ;;  %p3551_p13 = scmp.lt.s32.totalorder %s4272_s28, %s3549_s1 }
 0x178   : > { %p3546_p0 = pnand %p3544_p7, %p4821_p2  ;;  %p3552_p5 = scmp.lt.s32.totalorder %s3550_s27, %s3543_s23 }
 0x17a   : > { %p3547_p1 = pneg %p3546_p0  ;;  %p3553_p4 = por %p3552_p5, %p3551_p13 }
 0x17c   : > { %p3554_p3 = pnand %p3553_p4, %p3547_p1 }
 0x17e   : > { %3557 = shalt.err (!%p3554_p3)
}
 0x17f   : > { %p4822_p11 = scmp.ne.s32.totalorder %s4805_s12, 0  ;;  %s4823_s5 = sld [smem:[#allocation45_spill]] }
 0x180   : > { %s599_s8 = scalar_lea.vmem [#allocation7], %s4061_s0 }
 0x181   : > { %3070 = dma.hbm_to_vmem [thread:$0]  (!%p4822_p11), %s4269_s20, 256, %s4272_s28, %s553_s9, %s4809_s14, %s4809_s14, %s4808_s11  }
 0x182   : > { %s606_s15 = sshll.u32 %s599_s8, 4  ;;  %s4308_s15 = int_to_ptr.vmem [resolvable:$true] %s606_s15 }
 0x185   : > { %s4305_s6 = scalar_lea.hbm %s4823_s5, %s4058_s30  ;;  %s3563_s28 = scalar_lea.hbm %s4823_s5, 512 }
 0x186   : > { %s3558_s23 = scalar_lea.hbm %s4305_s6, 256  ;;  %p3564_p9 = scmp.lt.u32.totalorder %s4305_s6, %s4823_s5 }
 0x187   : > { %p3559_p12 = scmp.ne.s32.totalorder %s4305_s6, %s3558_s23  ;;  %p3565_p10 = scmp.lt.u32.totalorder %s3563_s28, %s3558_s23 }
 0x188   : > { %p3567_p0 = scmp.lt.u32.totalorder %s3558_s23, %s4305_s6 }
 0x189   : > { %p3561_p6 = pnand %p3559_p12, %p4821_p2  ;;  %p3566_p7 = por %p3565_p10, %p3564_p9 }
 0x18b   : > { %p3562_p8 = pneg %p3561_p6  ;;  %p3568_p1 = por %p3567_p0, %p3566_p7 }
 0x18d   : > { %p3569_p13 = pnand %p3568_p1, %p3562_p8 }
 0x18f   : > { %3572 = shalt.err (!%p3569_p13)
}
 0x190   : > { %s3573_s27 = scalar_lea.vmem %s4308_s15, 256  ;;  %s3774_s7 = smov [#allocation7]  }
 0x191   : > { %p3574_p5 = scmp.ne.s32.totalorder %s4308_s15, %s3573_s27  ;;  %s3578_s21 = sshll.u32 %s3774_s7, 4  ;;  %s3579_s21 = int_to_ptr.vmem [resolvable:$false] %s3578_s21 }
 0x192   : > { %s3580_s8 = scalar_lea.vmem %s3579_s21, 512  ;;  %p3581_p12 = scmp.lt.s32.totalorder %s4308_s15, %s3579_s21 }
 0x193   : > { %p3576_p4 = pnand %p3574_p5, %p4821_p2  ;;  %p3582_p6 = scmp.lt.s32.totalorder %s3580_s8, %s3573_s27 }
 0x195   : > { %p3577_p3 = pneg %p3576_p4  ;;  %p3583_p9 = por %p3582_p6, %p3581_p12 }
 0x197   : > { %p3584_p10 = pnand %p3583_p9, %p3577_p3 }
 0x199   : > { %3587 = shalt.err (!%p3584_p10)
}
 0x19a   : > { %s4824_s23 = scalar_lea.sflag [#allocation6], %s4070_s2  ;;  %s4825_s28 = sld [smem:[#allocation47_spill]] }
 0x19b   : > { %3076 = dma.hbm_to_vmem [thread:$0]  (!%p4822_p11), %s4305_s6, 256, %s4308_s15, %s4824_s23, %s4809_s14, %s4809_s14, %s4808_s11  }
 0x19c   : > { %s641_s1 = scalar_lea.vmem [#allocation10], %s4061_s0  ;;  %s2682_s7 = sshll.u32 %s4055_s17, 2 }
 0x19d   : > { %s648_s27 = sshll.u32 %s641_s1, 4  ;;  %s4343_s27 = int_to_ptr.vmem [resolvable:$true] %s648_s27 }
 0x1a0   : > { %s4340_s9 = scalar_lea.hbm %s4825_s28, %s4058_s30  ;;  %s3593_s8 = scalar_lea.hbm %s4825_s28, 512 }
 0x1a1   : > { %s3588_s21 = scalar_lea.hbm %s4340_s9, 256  ;;  %p3594_p1 = scmp.lt.u32.totalorder %s4340_s9, %s4825_s28 }
 0x1a2   : > { %p3589_p8 = scmp.ne.s32.totalorder %s4340_s9, %s3588_s21  ;;  %p3595_p13 = scmp.lt.u32.totalorder %s3593_s8, %s3588_s21 }
 0x1a3   : > { %p3597_p4 = scmp.lt.u32.totalorder %s3588_s21, %s4340_s9 }
 0x1a4   : > { %p3591_p7 = pnand %p3589_p8, %p4821_p2  ;;  %p3596_p5 = por %p3595_p13, %p3594_p1 }
 0x1a6   : > { %p3592_p0 = pneg %p3591_p7  ;;  %p3598_p3 = por %p3597_p4, %p3596_p5 }
 0x1a8   : > { %p3599_p12 = pnand %p3598_p3, %p3592_p0 }
 0x1aa   : > { %3602 = shalt.err (!%p3599_p12)
}
 0x1ab   : > { %s3603_s0 = scalar_lea.vmem %s4343_s27, 256  ;;  %s3775_s4 = smov [#allocation10]  }
 0x1ac   : > { %p3604_p6 = scmp.ne.s32.totalorder %s4343_s27, %s3603_s0  ;;  %s3608_s20 = sshll.u32 %s3775_s4, 4  ;;  %s3609_s20 = int_to_ptr.vmem [resolvable:$false] %s3608_s20 }
 0x1ad   : > { %s3610_s1 = scalar_lea.vmem %s3609_s20, 512  ;;  %p3611_p8 = scmp.lt.s32.totalorder %s4343_s27, %s3609_s20 }
 0x1ae   : > { %p3606_p9 = pnand %p3604_p6, %p4821_p2  ;;  %p3612_p7 = scmp.lt.s32.totalorder %s3610_s1, %s3603_s0 }
 0x1b0   : > { %p3607_p10 = pneg %p3606_p9  ;;  %p3613_p1 = por %p3612_p7, %p3611_p8 }
 0x1b2   : > { %p3614_p13 = pnand %p3613_p1, %p3607_p10 }
 0x1b4   : > { %3617 = shalt.err (!%p3614_p13)
}
 0x1b5   : > { %s4826_s21 = scalar_lea.sflag [#allocation9], %s4070_s2  ;;  %s2683_s6 = sshll.u32 %s3754_s22, 6 }
 0x1b6   : > { %3082 = dma.hbm_to_vmem [thread:$0]  (!%p4822_p11), %s4340_s9, 256, %s4343_s27, %s4826_s21, %s4809_s14, %s4809_s14, %s4808_s11  }
 0x1b7   : > { %s4827_s30 = sld [smem:[#allocation49_spill]]  ;;  %s679_s0 = scalar_lea.vmem [#allocation13], %s2682_s7 }
 0x1b8   : > { %s687_s4 = sshll.u32 %s679_s0, 4  ;;  %s688_s4 = int_to_ptr.vmem [resolvable:$true] %s687_s4 }
 0x1bd   : > { %s4376_s23 = scalar_lea.hbm %s4827_s30, %s2683_s6  ;;  %s3623_s9 = scalar_lea.hbm %s4827_s30, 128 }
 0x1be   : > { %s3618_s20 = scalar_lea.hbm %s4376_s23, 64  ;;  %p3624_p3 = scmp.lt.u32.totalorder %s4376_s23, %s4827_s30 }
 0x1bf   : > { %p3619_p0 = scmp.ne.s32.totalorder %s4376_s23, %s3618_s20  ;;  %p3625_p12 = scmp.lt.u32.totalorder %s3623_s9, %s3618_s20 }
 0x1c0   : > { %p3627_p9 = scmp.lt.u32.totalorder %s3618_s20, %s4376_s23 }
 0x1c1   : > { %p3621_p5 = pnand %p3619_p0, %p4821_p2  ;;  %p3626_p6 = por %p3625_p12, %p3624_p3 }
 0x1c3   : > { %p3622_p4 = pneg %p3621_p5  ;;  %p3628_p10 = por %p3627_p9, %p3626_p6 }
 0x1c5   : > { %p3629_p8 = pnand %p3628_p10, %p3622_p4 }
 0x1c7   : > { %3632 = shalt.err (!%p3629_p8)
}
 0x1c8   : > { %s3633_s17 = scalar_lea.vmem %s688_s4, 64  ;;  %s3776_s7 = smov [#allocation13]  }
 0x1c9   : > { %p3634_p7 = scmp.ne.s32.totalorder %s688_s4, %s3633_s17  ;;  %s3638_s21 = sshll.u32 %s3776_s7, 4  ;;  %s3639_s21 = int_to_ptr.vmem [resolvable:$false] %s3638_s21 }
 0x1ca   : > { %s3640_s6 = scalar_lea.vmem %s3639_s21, 128  ;;  %p3641_p0 = scmp.lt.s32.totalorder %s688_s4, %s3639_s21 }
 0x1cb   : > { %p3636_p1 = pnand %p3634_p7, %p4821_p2  ;;  %p3642_p5 = scmp.lt.s32.totalorder %s3640_s6, %s3633_s17 }
 0x1cd   : > { %p3637_p13 = pneg %p3636_p1  ;;  %p3643_p11 = por %p3642_p5, %p3641_p0 }
 0x1cf   : > { %p3644_p3 = pnand %p3643_p11, %p3637_p13 }
 0x1d1   : > { %3647 = shalt.err (!%p3644_p3)
}
 0x1d2   : > { %p4828_p12 = scmp.ne.s32.totalorder %s4805_s12, 0  ;;  %s4829_s15 = scalar_lea.sflag [#allocation12], %s4070_s2 }
 0x1d3   : > { %s4830_s8 = sld [smem:[#allocation39_spill]] }
 0x1d4   : > { %3088 = dma.hbm_to_vmem [thread:$0]  (!%p4828_p12), %s4376_s23, 64, %s688_s4, %s4829_s15  }
 0x1d9   : > { %p4831_p4 = scmp.ne.s32.totalorder %s4830_s8, 0 }
 0x1da   : > { %s4402_s13 = sand.u32 (!%p4831_p4), 1, %s3742_s19   ;;  %p4832_p2 = scmp.ne.s32.totalorder (!%p4831_p4), %s4800_s29, 0 }
 0x1db   : > { %696 = sbr.rel (%p4831_p4) target bundleno = 4874 (0x130a), region = 80  ;;  %s2685_s0 = sshll.u32 (!%p4831_p4), %s4402_s13, 4 }
 0x1dc   : > { %s699_s20 = scalar_lea.sflag (!%p4831_p4), [#allocation3], %s4402_s13  ;;  %s4406_s11 = scalar_lea.vmem (!%p4831_p4), [#allocation2], %s2685_s0 }
 0x1e2   : > { %3701 = dma.done.wait (%p4832_p2), %s699_s20, 256  }
 0x1e3   : > { %3703 = vsyncadd (%p4832_p2), %s699_s20, 4294967040  ;;  %s707_s12 = sand.u32 1, %s3894_s24   ;;  %s4413_s23 = scalar_lea.vmem [#allocation5], %s2685_s0 }
 0x1e4   : > { %s708_s2 = scalar_lea.sflag [#allocation6], %s707_s12 }
 0x1e5   : > { %3705 = dma.done.wait (%p4832_p2), %s708_s2, 512  }
 0x1e6   : > { %3707 = vsyncadd (%p4832_p2), %s708_s2, 4294966784  ;;  %s4419_s4 = scalar_lea.vmem [#allocation7], %s2685_s0  ;;  %s726_s14 = scalar_lea.sflag [#allocation9], %s707_s12 }
 0x1e7   : > { %s4421_s9 = scalar_lea.vmem [#allocation8], %s2685_s0 }
 0x1e8   : > { %3709 = dma.done.wait (%p4832_p2), %s726_s14, 512  }
 0x1e9   : > { %3711 = vsyncadd (%p4832_p2), %s726_s14, 4294966784  ;;  %s4427_s27 = scalar_lea.vmem [#allocation10], %s2685_s0  ;;  %s744_s1 = scalar_lea.sflag [#allocation12], %s707_s12 }
 0x1ea   : > { %s746_s17 = scalar_lea.vmem [#allocation11], %s4402_s13 }
 0x1eb   : > { %3713 = dma.done.wait (%p4832_p2), %s744_s1, 80  }
 0x1ec   : > { %3715 = vsyncadd (%p4832_p2), %s744_s1, 4294967216  ;;  %s2690_s7 = sshll.u32 %s4402_s13, 2  ;;  %p4833_p11 = scmp.eq.s32.totalorder %s3894_s24, 0 }
 0x1ed   : > { %s4435_s21 = scalar_lea.vmem [#allocation13], %s2690_s7 }
 0x1ee   : > { %3717 = dma.done.wait (%p4833_p11), [#allocation15], 272   ;;  %p4834_p6 = pmov %p4833_p11 }
 0x1f0   : > { %3719 = vsyncadd (%p4834_p6), [#allocation15], 4294967024  ;;  %p4835_p9 = pmov %p4834_p6 }
 0x1f1   : > { %p4836_p10 = pmov %p4834_p6 }
 0x1f2   : > { %3721 = dma.done.wait (%p4835_p9), [#allocation18], 272  }
 0x1f3   : > { %3723 = vsyncadd (%p4836_p10), [#allocation18], 4294967024  ;;  %p4837_p8 = pmov %p4834_p6 }
 0x1f4   : > { %p4838_p7 = pmov %p4834_p6 }
 0x1f5   : > { %3725 = dma.done.wait (%p4837_p8), [#allocation21], 272  }
 0x1f6   : > { %3727 = vsyncadd (%p4838_p7), [#allocation21], 4294967024  ;;  %p4839_p1 = pmov %p4834_p6 }
 0x1f8   : > { %3729 = dma.done.wait (%p4839_p1), [#allocation24], 528   ;;  %p4840_p13 = pmov %p4839_p1 }
 0x1f9   : > { %v3777_v0 = vmov 0.0   ;;  %vm3778_vm0 = vmmov 0   ;;  %vm874_vm1 = vcmask 1043456   ;;  %v869_v1 = vld [vmem:[%s4413_s23] sm:$0xf]  ;;  %vm870_vm2 = vcmask 64512  }
 0x1fa   : > { %3731 = vsyncadd (%p4840_p13), [#allocation24], 4294966768  ;;  %2822 = vmatprep.subr.bf16.mxu1 %v3777_v0  ;;  %2824 = vmatprep.mubr.msk.bf16.mxu1 %vm3778_vm0, %v3777_v0  ;;  %v2703_v2 = vld [vmem:[%s4413_s23 + $0x4] sm:$0xf]  ;;  %v876_v3 = vsel %vm874_vm1, %v869_v1, 0  ;;  %vm1536_vm3 = vcmask 261120  }
 0x1fb   : > { %2834 = vmatprep.subr.bf16.mxu0 %v3777_v0  ;;  %2836 = vmatprep.mubr.msk.bf16.mxu0 %vm3778_vm0, %v3777_v0  ;;  %v868_v4 = vld [vmem:[%s4406_s11] sm:$0xf]  ;;  %v987_v5 = vsel %vm874_vm1, %v2703_v2, 0  ;;  %v2702_v6 = vld [vmem:[%s4406_s11 + $0x4] sm:$0xf]  ;;  %s3779_s24 = smov 120  }
 0x1fc   : > { %2823 = vmatpush3.bf16.msra.mxu1 %v876_v3  ;;  %2835 = vmatpush3.bf16.msra.mxu0 %v987_v5  ;;  %v864_v7 = vld [vmem:[%s4435_s21] sm:$0xf]  ;;  %v978_v37 = vld [vmem:[#allocation17] sm:$0xf]  ;;  %v2710_v52 = vld [vmem:[%s4413_s23 + $0x8] sm:$0xf] }
 0x1fd   : > { %2828 = vmatprep.subr.bf16.mxu1 %v3777_v0  ;;  %2846 = vmatprep.subr.bf16.mxu0 %v3777_v0  ;;  %v4474_v8 = vunpack.c.l.bf16 %v864_v7  ;;  %v928_v21 = vld [vmem:[%s4419_s4] sm:$0xf]  ;;  %v2705_v29 = vld [vmem:[%s4419_s4 + $0x4] sm:$0xf]  ;;  %v4495_v38 = vsel %vm874_vm1, %v978_v37, 0  ;;  %v1192_v58 = vsel %vm874_vm1, %v2710_v52, 0 }
 0x1fe   : > { %v933_v22 = vsel %vm874_vm1, %v928_v21, 0  ;;  %v1045_v32 = vsel %vm874_vm1, %v2705_v29, 0  ;;  %v1091_v39 = vld [vmem:[#allocation17 + $0x4] sm:$0xf]  ;;  %v2709_v59 = vld [vmem:[%s4406_s11 + $0x8] sm:$0xf] }
 0x1ff   : > { %2825 = vmatmul.mubr.msk.bf16.vlgmr.msra.gmra.mrb[0].mxu1 %vm870_vm2, %v868_v4  ;;  %2837 = vmatmul.mubr.msk.bf16.vlgmr.msra.gmra.mrb[0].mxu0 %vm870_vm2, %v2702_v6  ;;  %v4500_v40 = vsel %vm874_vm1, %v1091_v39, 0  ;;  %s3780_s29 = smov 104   ;;  %s3781_s6 = smov 112   ;;  %vm2310_vm4 = vcmask 523264  }
 0x200   : > { %2830 = vmatprep.mubr.msk.bf16.mxu1 %vm3778_vm0, %v3777_v0  ;;  %2848 = vmatprep.mubr.msk.bf16.mxu0 %vm3778_vm0, %v3777_v0  ;;  %s4841_s15 = sld [smem:[#allocation37_spill]]  ;;  %s2699_s8 = sshll.u32 %s4402_s13, 3 }
 0x201   : > { %2829 = vmatpush3.bf16.msra.mxu1 %v933_v22  ;;  %2847 = vmatpush3.bf16.msra.mxu0 %v4500_v40  ;;  %s862_s20 = scalar_lea.vmem [#allocation26], %s2699_s8  ;;  %p4844_p5 = scmp.ne.s32.totalorder %s4801_s16, 0 }
 0x202   : > { %2840 = vmatprep.subr.bf16.mxu1 %v3777_v0  ;;  %2858 = vmatprep.subr.bf16.mxu0 %v3777_v0  ;;  %s3782_s1 = smov [#allocation26]  }
 0x206   : > { %s2755_s0 = sshll.u32 %s4841_s15, 7 }
 0x2d2   : > { %v912_v9 = vpop.f32.mrb[0].mxu1  ;;  %v1023_v10 = vpop.f32.mrb[0].mxu0 }
 0x2d3   : > { %v913_v11 = vadd.f32 %v912_v9, %v4474_v8  ;;  %v2826_v12 = vpop.f32.mrb[1].mxu1  ;;  %v1024_v13 = vadd.f32 %v1023_v10, %v4474_v8  ;;  %v2838_v14 = vpop.f32.mrb[1].mxu0 }
 0x2d4   : > { %v915_v15 = vpop.f32.mrb[2].mxu1  ;;  %v1026_v16 = vpop.f32.mrb[2].mxu0 }
 0x2d5   : > { %v2827_v17 = vpop.f32.mrb[3].mxu1  ;;  %v918_v18 = vsel %vm870_vm2, %v913_v11, -inf  ;;  %v2839_v19 = vpop.f32.mrb[3].mxu0  ;;  %v1029_v20 = vsel %vm870_vm2, %v1024_v13, -inf }
 0x2d6   : > { %919 = vmax.xlane.f32.xlu0 %v918_v18  ;;  %v2716_v18 = vld [vmem:[%s4413_s23 + $0xc] sm:$0xf]  ;;  %s4842_s23 = sld [smem:[#allocation57_spill]] }
 0x2d7   : > { %v1352_v22 = vsel %vm874_vm1, %v2716_v18, 0 }
 0x2da   : > { %1030 = vmax.xlane.f32.xlu0 %v1029_v20 }
 0x2dc   : > { %s4673_s14 = scalar_lea.hbm %s4842_s23, %s2755_s0 }
 0x363   : > { %v920_v23 = vpop.xlane.xlu0 %919 }
 0x364   : > { %v921_v24 = vsub.f32 %v913_v11, %v920_v23  ;;  %v2715_v23 = vld [vmem:[%s4406_s11 + $0xc] sm:$0xf]  ;;  %s2370_s11 = sshll.u32 %s862_s20, 4  ;;  %s4675_s11 = int_to_ptr.vmem [resolvable:$true] %s2370_s11 }
 0x366   : > { %v922_v25 = vmul.f32 1.442695, %v921_v24  ;;  %v1296_v24 = vld [vmem:[#allocation17 + $0x8] sm:$0xf] }
 0x367   : > { %v1031_v26 = vpop.xlane.xlu0 %1030 }
 0x368   : > { %3182 = vpow2.f32 %v922_v25  ;;  %v1032_v27 = vsub.f32 %v1024_v13, %v1031_v26  ;;  %v2712_v13 = vld [vmem:[%s4419_s4 + $0x8] sm:$0xf]  ;;  %v4536_v25 = vsel %vm874_vm1, %v1296_v24, 0 }
 0x369   : > { %v1250_v14 = vsel %vm874_vm1, %v2712_v13, 0 }
 0x36a   : > { %v1033_v28 = vmul.f32 1.442695, %v1032_v27 }
 0x36c   : > { %3184 = vpow2.f32 %v1033_v28 }
 0x372   : > { %v3183_v30 = vpop.eup %3182 }
 0x373   : > { %v927_v31 = vpack.c.bf16 %v3183_v30, %v3183_v30  ;;  %v924_v35 = vsel %vm870_vm2, %v3183_v30, 0.0 }
 0x375   : > { %2831 = vmatmul.mubr.msk.bf16.vlgmr.msra.gmra.mrb[4].mxu1 %vm870_vm2, %v927_v31 }
 0x376   : > { %v3185_v33 = vpop.eup %3184  ;;  %2841 = vmatpush3.bf16.msra.mxu1 %v1045_v32  ;;  %2842 = vmatprep.mubr.msk.bf16.mxu1 %vm3778_vm0, %v3777_v0 }
 0x377   : > { %v1035_v34 = vsel %vm870_vm2, %v3185_v33, 0.0  ;;  %2852 = vmatprep.subr.bf16.mxu1 %v3777_v0  ;;  %v1038_v36 = vpack.c.bf16 %v3185_v33, %v3185_v33 }
 0x378   : > { %1036 = vadd.xlane.f32.xlu1 %v1035_v34 }
 0x37c   : > { %925 = vadd.xlane.f32.xlu1 %v924_v35 }
 0x37d   : > { %2843 = vmatmul.mubr.msk.bf16.vlgmr.msra.gmra.mrb[8].mxu1 %vm870_vm2, %v1038_v36 }
 0x37e   : > { %2854 = vmatprep.mubr.msk.bf16.mxu1 %vm3778_vm0, %v3777_v0  ;;  %2853 = vmatpush3.bf16.msra.mxu1 %v4495_v38 }
 0x37f   : > { %2864 = vmatprep.subr.bf16.mxu1 %v3777_v0 }
 0x405   : > { %v1037_v41 = vpop.xlane.xlu1 %1036 }
 0x409   : > { %v926_v42 = vpop.xlane.xlu1 %925 }
 0x40a   : > { %3186 = vrcp.f32 %v926_v42  ;;  %v2718_v42 = vld [vmem:[%s4419_s4 + $0xc] sm:$0xf]  ;;  %s4843_s4 = smov %s4842_s23 }
 0x40b   : > { %3188 = vrcp.f32 %v1037_v41 }
 0x414   : > { %v3187_v43 = vpop.eup %3186 }
 0x415   : > { %v3189_v50 = vpop.eup %3188 }
 0x448   : > { %v969_v44 = vpop.f32.mrb[4].mxu1 }
 0x449   : > { %v976_v45 = vmul.f32 %v3187_v43, %v969_v44  ;;  %v2832_v46 = vpop.f32.mrb[5].mxu1  ;;  %v1410_v43 = vsel %vm874_vm1, %v2718_v42, 0 }
 0x44a   : > { %v972_v47 = vpop.f32.mrb[6].mxu1 }
 0x44b   : > { %v977_v48 = vpack.c.bf16 %v976_v45, %v976_v45  ;;  %v2833_v49 = vpop.f32.mrb[7].mxu1 }
 0x44c   : > { %v1456_v49 = vld [vmem:[#allocation17 + $0xc] sm:$0xf] }
 0x44d   : > { %2855 = vmatmul.mubr.msk.bf16.vlgmr.msra.gmra.mrb[12].mxu1 %vm870_vm2, %v977_v48 }
 0x44e   : > { %2866 = vmatprep.mubr.msk.bf16.mxu1 %vm3778_vm0, %v3777_v0  ;;  %2865 = vmatpush3.bf16.msra.mxu1 %v1250_v14  ;;  %v2722_v14 = vld [vmem:[#allocation16] ss:$0 sm:$0xff] }
 0x44f   : > { %2876 = vmatprep.subr.bf16.mxu1 %v3777_v0 }
 0x450   : > { %v1081_v51 = vpop.f32.mrb[8].mxu1 }
 0x451   : > { %v1088_v53 = vmul.f32 %v3189_v50, %v1081_v51  ;;  %v2844_v54 = vpop.f32.mrb[9].mxu1  ;;  %v4553_v50 = vsel %vm874_vm1, %v1456_v49, 0  ;;  %v2730_v49 = vld [vmem:[%s4427_s27 + $0x4] sm:$0xf] }
 0x452   : > { %v1084_v55 = vpop.f32.mrb[10].mxu1 }
 0x453   : > { %v1089_v56 = vpack.c.bf16 %v1088_v53, %v1088_v53  ;;  %v2845_v57 = vpop.f32.mrb[11].mxu1 }
 0x455   : > { %2849 = vmatmul.mubr.msk.bf16.vlgmr.msra.gmra.mrb[4].mxu0 %vm870_vm2, %v1089_v56  ;;  %v3174_v56 = vld [vmem:[#allocation14] sm:$0xff]  }
 0x456   : > { %2859 = vmatpush3.bf16.msra.mxu0 %v1192_v58  ;;  %2860 = vmatprep.mubr.msk.bf16.mxu0 %vm3778_vm0, %v3777_v0 }
 0x457   : > { %2870 = vmatprep.subr.bf16.mxu0 %v3777_v0 }
 0x45d   : > { %2861 = vmatmul.mubr.msk.bf16.vlgmr.msra.gmra.mrb[8].mxu0 %vm870_vm2, %v2709_v59 }
 0x45e   : > { %2872 = vmatprep.mubr.msk.bf16.mxu0 %vm3778_vm0, %v3777_v0  ;;  %2871 = vmatpush3.bf16.msra.mxu0 %v4536_v25 }
 0x45f   : > { %2882 = vmatprep.subr.bf16.mxu0 %v3777_v0 }
 0x520   : > { %v1178_v60 = vpop.f32.mrb[12].mxu1 }
 0x521   : > { %v2856_v61 = vpop.f32.mrb[13].mxu1 }
 0x522   : > { %v1181_v62 = vpop.f32.mrb[14].mxu1 }
 0x523   : > { %v2857_v63 = vpop.f32.mrb[15].mxu1 }
 0x528   : > { %v1132_v1 = vpop.f32.mrb[4].mxu0 }
 0x529   : > { %v4517_v2 = vadd.f32 %v1178_v60, %v1132_v1  ;;  %v2850_v3 = vpop.f32.mrb[5].mxu0 }
 0x52a   : > { %v1135_v4 = vpop.f32.mrb[6].mxu0 }
 0x52b   : > { %v2851_v5 = vpop.f32.mrb[7].mxu0  ;;  %v4563_v4 = vld [vmem:[#allocation19] ss:$0 sm:$0xff] }
 0x530   : > { %v1228_v6 = vpop.f32.mrb[8].mxu0 }
 0x531   : > { %v1229_v7 = vadd.f32 %v1228_v6, %v4474_v8  ;;  %v2862_v9 = vpop.f32.mrb[9].mxu0 }
 0x532   : > { %v1231_v10 = vpop.f32.mrb[10].mxu0 }
 0x533   : > { %v2863_v11 = vpop.f32.mrb[11].mxu0  ;;  %v1234_v12 = vsel %vm870_vm2, %v1229_v7, -inf }
 0x534   : > { %1235 = vmax.xlane.f32.xlu0 %v1234_v12  ;;  %v1582_v12 = vld [vmem:[%s4421_s9] sm:$0xf] }
 0x535   : > { %v1591_v13 = vsel %vm874_vm1, %v1582_v12, 0 }
 0x5c1   : > { %v1236_v15 = vpop.xlane.xlu0 %1235 }
 0x5c2   : > { %v1237_v16 = vsub.f32 %v1229_v7, %v1236_v15 }
 0x5c4   : > { %v1238_v17 = vmul.f32 1.442695, %v1237_v16 }
 0x5c6   : > { %3190 = vpow2.f32 %v1238_v17 }
 0x5d0   : > { %v3191_v19 = vpop.eup %3190 }
 0x5d1   : > { %v1240_v20 = vsel %vm870_vm2, %v3191_v19, 0.0  ;;  %v1243_v21 = vpack.c.bf16 %v3191_v19, %v3191_v19  ;;  %v2728_v19 = vld [vmem:[%s4421_s9 + $0x4] sm:$0xf] }
 0x5d2   : > { %1241 = vadd.xlane.f32.xlu1 %v1240_v20 }
 0x5d3   : > { %2867 = vmatmul.mubr.msk.bf16.vlgmr.msra.gmra.mrb[16].mxu1 %vm870_vm2, %v1243_v21 }
 0x5d4   : > { %2877 = vmatpush3.bf16.msra.mxu1 %v1352_v22  ;;  %2878 = vmatprep.mubr.msk.bf16.mxu1 %vm3778_vm0, %v3777_v0 }
 0x5d5   : > { %2888 = vmatprep.subr.bf16.mxu1 %v3777_v0 }
 0x5db   : > { %2879 = vmatmul.mubr.msk.bf16.vlgmr.msra.gmra.mrb[20].mxu1 %vm870_vm2, %v2715_v23  ;;  %v1702_v23 = vsel %vm874_vm1, %v2728_v19, 0 }
 0x5dc   : > { %2890 = vmatprep.mubr.msk.bf16.mxu1 %vm3778_vm0, %v3777_v0  ;;  %2889 = vmatpush3.bf16.msra.mxu1 %v4553_v50 }
 0x5dd   : > { %2902 = vmatprep.subr.bf16.mxu1 %v3777_v0 }
 0x65f   : > { %v1242_v26 = vpop.xlane.xlu1 %1241 }
 0x660   : > { %3192 = vrcp.f32 %v1242_v26  ;;  %v1583_v26 = vlaneseq }
 0x66a   : > { %v3193_v27 = vpop.eup %3192 }
 0x6a6   : > { %v1286_v28 = vpop.f32.mrb[16].mxu1 }
 0x6a7   : > { %v1293_v29 = vmul.f32 %v3193_v27, %v1286_v28  ;;  %v2868_v30 = vpop.f32.mrb[17].mxu1  ;;  %v1584_v27 = vshrl.u32 %v1583_v26, 7  ;;  %v866_v28 = vld [vmem:[%s746_s17] sm:$0x1]  ;;  %s3652_s17 = sshll.u32 %s3782_s1, 4  ;;  %s3653_s17 = int_to_ptr.vmem [resolvable:$false] %s3652_s17 }
 0x6a8   : > { %v1289_v31 = vpop.f32.mrb[18].mxu1  ;;  %s3654_s7 = scalar_lea.vmem %s3653_s17, 256  ;;  %p3655_p4 = scmp.lt.s32.totalorder %s4675_s11, %s3653_s17 }
 0x6a9   : > { %v1294_v32 = vpack.c.bf16 %v1293_v29, %v1293_v29  ;;  %v2869_v33 = vpop.f32.mrb[19].mxu1  ;;  %v867_v29 = vunpack.c.l.bf16 %v866_v28  ;;  %v1585_v30 = vsub.s32 0, %v1584_v27 }
 0x6ab   : > { %2873 = vmatmul.mubr.msk.bf16.vlgmr.msra.gmra.mrb[12].mxu0 %vm870_vm2, %v1294_v32  ;;  %v4589_v31 = vrot.slane %v867_v29, %v1585_v30 }
 0x6ac   : > { %2884 = vmatprep.mubr.msk.bf16.mxu0 %vm3778_vm0, %v3777_v0  ;;  %2883 = vmatpush3.bf16.msra.mxu0 %v1410_v43 }
 0x6ad   : > { %2894 = vmatprep.subr.bf16.mxu0 %v3777_v0 }
 0x6ae   : > { %v1388_v34 = vpop.f32.mrb[20].mxu1 }
 0x6af   : > { %v1389_v35 = vadd.f32 %v1388_v34, %v4474_v8  ;;  %v2880_v36 = vpop.f32.mrb[21].mxu1 }
 0x6b0   : > { %v1391_v37 = vpop.f32.mrb[22].mxu1 }
 0x6b1   : > { %v2881_v39 = vpop.f32.mrb[23].mxu1  ;;  %v1394_v41 = vsel %vm870_vm2, %v1389_v35, -inf  ;;  %v1643_v37 = vld [vmem:[%s4427_s27] sm:$0xf] }
 0x6b2   : > { %1395 = vmax.xlane.f32.xlu0 %v1394_v41  ;;  %v1648_v39 = vsel %vm874_vm1, %v1643_v37, 0 }
 0x73f   : > { %v1396_v44 = vpop.xlane.xlu0 %1395 }
 0x740   : > { %v1397_v45 = vsub.f32 %v1389_v35, %v1396_v44 }
 0x742   : > { %v1398_v46 = vmul.f32 1.442695, %v1397_v45 }
 0x744   : > { %3194 = vpow2.f32 %v1398_v46 }
 0x74e   : > { %v3195_v47 = vpop.eup %3194 }
 0x74f   : > { %v1400_v48 = vsel %vm870_vm2, %v3195_v47, 0.0  ;;  %v1403_v8 = vpack.c.bf16 %v3195_v47, %v3195_v47 }
 0x750   : > { %1401 = vadd.xlane.f32.xlu1 %v1400_v48 }
 0x751   : > { %2885 = vmatmul.mubr.msk.bf16.vlgmr.msra.gmra.mrb[16].mxu0 %vm870_vm2, %v1403_v8 }
 0x752   : > { %2898 = vmatprep.mubr.msk.bf16.mxu0 %vm3778_vm0, %v3777_v0  ;;  %2895 = vmatpush3.bf16.msra.mxu0 %v3174_v56 }
 0x753   : > { %2896 = vmatprep.subr.bf16.mxu0 %v3777_v0 }
 0x77e   : > { %v1337_v51 = vpop.f32.mrb[12].mxu0 }
 0x77f   : > { %v1343_v52 = vadd.f32 %v1337_v51, %v4517_v2  ;;  %v2874_v53 = vpop.f32.mrb[13].mxu0  ;;  %v3175_v2 = vld [vmem:[#allocation14 + $0x8] sm:$0xff]  }
 0x780   : > { %v1340_v54 = vpop.f32.mrb[14].mxu0  ;;  %2897 = vmatpush3.bf16.msra.mxu0 %v3175_v2 }
 0x781   : > { %v2875_v55 = vpop.f32.mrb[15].mxu0  ;;  %2908 = vmatprep.subr.bf16.mxu0 %v3777_v0  ;;  %v1760_v54 = vsel %vm874_vm1, %v2730_v49, 0 }
 0x7dd   : > { %v1402_v57 = vpop.xlane.xlu1 %1401 }
 0x7de   : > { %3196 = vrcp.f32 %v1402_v57 }
 0x7e8   : > { %v3197_v58 = vpop.eup %3196 }
 0x824   : > { %v1446_v59 = vpop.f32.mrb[16].mxu0 }
 0x825   : > { %v1453_v60 = vmul.f32 %v3197_v58, %v1446_v59  ;;  %v2886_v61 = vpop.f32.mrb[17].mxu0 }
 0x826   : > { %v1449_v62 = vpop.f32.mrb[18].mxu0 }
 0x827   : > { %v1454_v63 = vpack.c.bf16 %v1453_v60, %v1453_v60  ;;  %v2887_v1 = vpop.f32.mrb[19].mxu0 }
 0x829   : > { %2891 = vmatmul.mubr.msk.bf16.vlgmr.msra.gmra.mrb[24].mxu1 %vm870_vm2, %v1454_v63 }
 0x82a   : > { %2904 = vmatprep.mubr.msk.bf16.mxu1 %vm3778_vm0, %v3777_v0  ;;  %2903 = vmatpush3.bf16.msra.mxu1 %v1591_v13 }
 0x82b   : > { %2914 = vmatprep.subr.bf16.mxu1 %v3777_v0 }
 0x8fc   : > { %v1497_v3 = vpop.f32.mrb[24].mxu1 }
 0x8fd   : > { %v1503_v5 = vadd.f32 %v1497_v3, %v1343_v52  ;;  %v2892_v6 = vpop.f32.mrb[25].mxu1 }
 0x8fe   : > { %v1500_v7 = vpop.f32.mrb[26].mxu1 }
 0x8ff   : > { %v1511_v9 = vadd.f32 %v4563_v4, %v1503_v5  ;;  %v2893_v10 = vpop.f32.mrb[27].mxu1 }
 0x900   : > { %v2734_v10 = vld [vmem:[%s4421_s9 + $0x8] sm:$0xf] }
 0x901   : > { %v1512_v11 = vpack.c.bf16 %v1511_v9, %v1511_v9 }
 0x903   : > { %2899 = vmatmul.mubr.msk.bf16.vlgmr.msra.gmra.mrb[20].mxu0 %vm1536_vm3, %v1512_v11 }
 0x904   : > { %2910 = vmatprep.mubr.msk.bf16.mxu0 %vm3778_vm0, %v3777_v0  ;;  %2909 = vmatpush3.bf16.msra.mxu0 %v1648_v39  ;;  %v2739_v39 = vld [vmem:[%s4421_s9 + $0xc] sm:$0xf]  ;;  %s2356_s9 = scalar_lea.sflag [#allocation4], %s4402_s13 }
 0x905   : > { %2920 = vmatprep.subr.bf16.mxu0 %v3777_v0 }
 0x9d6   : > { %v1574_v15 = vpop.f32.mrb[20].mxu0 }
 0x9d7   : > { %v1575_v16 = vadd.f32 %v2722_v14, %v1574_v15  ;;  %v2900_v17 = vpop.f32.mrb[21].mxu0 }
 0x9d8   : > { %v1577_v18 = vpop.f32.mrb[22].mxu0 }
 0x9d9   : > { %v1580_v20 = vmul.f32 0.35355338, %v1575_v16  ;;  %v2901_v21 = vpop.f32.mrb[23].mxu0  ;;  %v1899_v16 = vsel %vm874_vm1, %v2734_v10, 0 }
 0x9db   : > { %v4573_v22 = vpack.c.bf16 %v1580_v20, %v1580_v20 }
 0x9dd   : > { %1696 = vrot.lane.b32.xlu0 %v4573_v22, %s3779_s24  ;;  %2905 = vmatmul.mubr.msk.bf16.vlgmr.msra.gmra.mrb[28].mxu1 %vm870_vm2, %v4573_v22 }
 0x9de   : > { %2915 = vmatpush3.bf16.msra.mxu1 %v1702_v23  ;;  %2916 = vmatprep.mubr.msk.bf16.mxu1 %vm3778_vm0, %v3777_v0 }
 0x9df   : > { %2926 = vmatprep.subr.bf16.mxu1 %v3777_v0 }
 0xa4f   : > { %v1697_v24 = vpop.permute.xlu0 %1696 }
 0xa50   : > { %2917 = vmatmul.mubr.msk.bf16.vlgmr.msra.gmra.mrb[32].mxu1 %vm870_vm2, %v1697_v24 }
 0xa51   : > { %2927 = vmatpush3.bf16.msra.mxu1 %v4500_v40  ;;  %2928 = vmatprep.mubr.msk.bf16.mxu1 %vm3778_vm0, %v3777_v0 }
 0xa52   : > { %2938 = vmatprep.subr.bf16.mxu1 %v3777_v0 }
 0xab0   : > { %v1627_v32 = vpop.f32.mrb[28].mxu1 }
 0xab1   : > { %v1628_v33 = vadd.f32 %v1627_v32, %v4589_v31  ;;  %v2906_v34 = vpop.f32.mrb[29].mxu1 }
 0xab2   : > { %v1630_v35 = vpop.f32.mrb[30].mxu1  ;;  %v2736_v34 = vld [vmem:[%s4427_s27 + $0x8] sm:$0xf] }
 0xab3   : > { %v2907_v40 = vpop.f32.mrb[31].mxu1  ;;  %v1633_v36 = vsel %vm870_vm2, %v1628_v33, -inf  ;;  %v1957_v35 = vsel %vm874_vm1, %v2736_v34, 0 }
 0xab4   : > { %1634 = vmax.xlane.f32.xlu1 %v1633_v36 }
 0xb23   : > { %v1738_v41 = vpop.f32.mrb[32].mxu1 }
 0xb24   : > { %v1739_v42 = vadd.f32 %v1738_v41, %v4589_v31  ;;  %v2918_v43 = vpop.f32.mrb[33].mxu1 }
 0xb25   : > { %v1741_v44 = vpop.f32.mrb[34].mxu1 }
 0xb26   : > { %v2919_v45 = vpop.f32.mrb[35].mxu1  ;;  %v1744_v46 = vsel %vm870_vm2, %v1739_v42, -inf  ;;  %v2054_v44 = vsel %vm874_vm1, %v2739_v39, 0 }
 0xb27   : > { %1745 = vmax.xlane.f32.xlu1 %v1744_v46 }
 0xb41   : > { %v1635_v47 = vpop.xlane.xlu1 %1634 }
 0xb42   : > { %v1636_v48 = vsub.f32 %v1628_v33, %v1635_v47 }
 0xb44   : > { %v1637_v8 = vmul.f32 1.442695, %v1636_v48 }
 0xb46   : > { %3198 = vpow2.f32 %v1637_v8 }
 0xb50   : > { %v3199_v51 = vpop.eup %3198 }
 0xb51   : > { %v1639_v52 = vsel %vm870_vm2, %v3199_v51, 0.0  ;;  %v1642_v53 = vpack.c.bf16 %v3199_v51, %v3199_v51 }
 0xb52   : > { %1640 = vadd.xlane.f32.xlu0 %v1639_v52 }
 0xb53   : > { %2911 = vmatmul.mubr.msk.bf16.vlgmr.msra.gmra.mrb[24].mxu0 %vm870_vm2, %v1642_v53 }
 0xb54   : > { %2921 = vmatpush3.bf16.msra.mxu0 %v1760_v54  ;;  %2922 = vmatprep.mubr.msk.bf16.mxu0 %vm3778_vm0, %v3777_v0 }
 0xb55   : > { %2932 = vmatprep.subr.bf16.mxu0 %v3777_v0 }
 0xb68   : > { %2048 = vrot.lane.b32.xlu0 %v4573_v22, %s3780_s29 }
 0xbb4   : > { %v1746_v55 = vpop.xlane.xlu1 %1745 }
 0xbb5   : > { %v1747_v56 = vsub.f32 %v1739_v42, %v1746_v55 }
 0xbb7   : > { %v1748_v57 = vmul.f32 1.442695, %v1747_v56 }
 0xbb9   : > { %3200 = vpow2.f32 %v1748_v57 }
 0xbc3   : > { %v3201_v58 = vpop.eup %3200 }
 0xbc4   : > { %v1750_v59 = vsel %vm870_vm2, %v3201_v58, 0.0  ;;  %v1753_v60 = vpack.c.bf16 %v3201_v58, %v3201_v58 }
 0xbc5   : > { %1751 = vadd.xlane.f32.xlu1 %v1750_v59  ;;  %v2741_v59 = vld [vmem:[%s4427_s27 + $0xc] sm:$0xf]  ;;  %s3648_s27 = scalar_lea.vmem %s4675_s11, 128 }
 0xbc6   : > { %2923 = vmatmul.mubr.msk.bf16.vlgmr.msra.gmra.mrb[28].mxu0 %vm870_vm2, %v1753_v60  ;;  %v2112_v60 = vsel %vm874_vm1, %v2741_v59, 0  ;;  %p3649_p0 = scmp.ne.s32.totalorder %s4675_s11, %s3648_s27  ;;  %p3656_p2 = scmp.lt.s32.totalorder %s3654_s7, %s3648_s27 }
 0xbc7   : > { %2933 = vmatpush3.bf16.msra.mxu0 %v4495_v38  ;;  %2934 = vmatprep.mubr.msk.bf16.mxu0 %vm3778_vm0, %v3777_v0 }
 0xbc8   : > { %2944 = vmatprep.subr.bf16.mxu0 %v3777_v0  ;;  %p3650_p3 = pnand %p3649_p0, %p4844_p5  ;;  %p3657_p11 = por %p3656_p2, %p3655_p4 }
 0xbca   : > { %p3651_p12 = pneg %p3650_p3 }
 0xbcc   : > { %p3658_p6 = pnand %p3657_p11, %p3651_p12 }
 0xbd6   : > { %1893 = vrot.lane.b32.xlu1 %v4573_v22, %s3781_s6 }
 0xbdf   : > { %v1641_v61 = vpop.xlane.xlu0 %1640 }
 0xbe0   : > { %3202 = vrcp.f32 %v1641_v61 }
 0xbe3   : > { %v2049_v45 = vpop.permute.xlu0 %2048 }
 0xbea   : > { %v3203_v62 = vpop.eup %3202 }
 0xc26   : > { %v1684_v63 = vpop.f32.mrb[24].mxu0 }
 0xc27   : > { %v1691_v1 = vmul.f32 %v3203_v62, %v1684_v63  ;;  %v2912_v2 = vpop.f32.mrb[25].mxu0 }
 0xc28   : > { %v1687_v3 = vpop.f32.mrb[26].mxu0 }
 0xc29   : > { %v1692_v5 = vpack.c.bf16 %v1691_v1, %v1691_v1  ;;  %v2913_v6 = vpop.f32.mrb[27].mxu0 }
 0xc2b   : > { %2935 = vmatmul.mubr.msk.bf16.vlgmr.msra.gmra.mrb[32].mxu0 %vm870_vm2, %v1692_v5 }
 0xc2c   : > { %2946 = vmatprep.mubr.msk.bf16.mxu0 %vm3778_vm0, %v3777_v0  ;;  %2945 = vmatpush3.bf16.msra.mxu0 %v1957_v35 }
 0xc2d   : > { %2956 = vmatprep.subr.bf16.mxu0 %v3777_v0 }
 0xc52   : > { %v1752_v38 = vpop.xlane.xlu1 %1751 }
 0xc53   : > { %3204 = vrcp.f32 %v1752_v38 }
 0xc56   : > { %v1894_v17 = vpop.permute.xlu1 %1893 }
 0xc5d   : > { %v3205_v7 = vpop.eup %3204 }
 0xc99   : > { %v1796_v9 = vpop.f32.mrb[28].mxu0 }
 0xc9a   : > { %v1803_v11 = vmul.f32 %v3205_v7, %v1796_v9  ;;  %v2924_v12 = vpop.f32.mrb[29].mxu0  ;;  %v3176_v9 = vld [vmem:[#allocation20] sm:$0xff]  }
 0xc9b   : > { %v1799_v13 = vpop.f32.mrb[30].mxu0 }
 0xc9c   : > { %v1804_v14 = vpack.c.bf16 %v1803_v11, %v1803_v11  ;;  %v2925_v15 = vpop.f32.mrb[31].mxu0 }
 0xc9e   : > { %2929 = vmatmul.mubr.msk.bf16.vlgmr.msra.gmra.mrb[36].mxu1 %vm870_vm2, %v1804_v14 }
 0xc9f   : > { %2939 = vmatpush3.bf16.msra.mxu1 %v1899_v16  ;;  %2940 = vmatprep.mubr.msk.bf16.mxu1 %vm3778_vm0, %v3777_v0 }
 0xca0   : > { %2950 = vmatprep.subr.bf16.mxu1 %v3777_v0 }
 0xca6   : > { %2941 = vmatmul.mubr.msk.bf16.vlgmr.msra.gmra.mrb[40].mxu1 %vm870_vm2, %v1894_v17 }
 0xca7   : > { %2951 = vmatpush3.bf16.msra.mxu1 %v4536_v25  ;;  %2952 = vmatprep.mubr.msk.bf16.mxu1 %vm3778_vm0, %v3777_v0 }
 0xca8   : > { %2962 = vmatprep.subr.bf16.mxu1 %v3777_v0 }
 0xcfe   : > { %v1885_v18 = vpop.f32.mrb[32].mxu0 }
 0xcff   : > { %v2936_v19 = vpop.f32.mrb[33].mxu0 }
 0xd00   : > { %v1888_v20 = vpop.f32.mrb[34].mxu0  ;;  %v3178_v19 = vld [vmem:[#allocation23] sm:$0xff]  }
 0xd01   : > { %v2937_v21 = vpop.f32.mrb[35].mxu0  ;;  %v3179_v20 = vld [vmem:[#allocation23 + $0x8] sm:$0xff]  }
 0xd71   : > { %v1842_v22 = vpop.f32.mrb[36].mxu1 }
 0xd72   : > { %v4627_v23 = vadd.f32 %v1885_v18, %v1842_v22  ;;  %v2930_v24 = vpop.f32.mrb[37].mxu1  ;;  %v3177_v18 = vld [vmem:[#allocation20 + $0x8] sm:$0xff]  }
 0xd73   : > { %v1845_v26 = vpop.f32.mrb[38].mxu1 }
 0xd74   : > { %v2931_v27 = vpop.f32.mrb[39].mxu1 }
 0xd79   : > { %v1935_v28 = vpop.f32.mrb[40].mxu1 }
 0xd7a   : > { %v1936_v25 = vadd.f32 %v1935_v28, %v4589_v31  ;;  %v2942_v29 = vpop.f32.mrb[41].mxu1 }
 0xd7b   : > { %v1938_v30 = vpop.f32.mrb[42].mxu1  ;;  %v3181_v29 = vld [vmem:[#allocation23 + $0x18] sm:$0xff]  }
 0xd7c   : > { %v2943_v32 = vpop.f32.mrb[43].mxu1  ;;  %v1941_v33 = vsel %vm870_vm2, %v1936_v25, -inf  ;;  %v2744_v30 = vld [vmem:[#allocation22] ss:$0 sm:$0xff] }
 0xd7d   : > { %1942 = vmax.xlane.f32.xlu1 %v1941_v33 }
 0xe0a   : > { %v1943_v40 = vpop.xlane.xlu1 %1942 }
 0xe0b   : > { %v1944_v36 = vsub.f32 %v1936_v25, %v1943_v40  ;;  %v3180_v25 = vld [vmem:[#allocation23 + $0x10] sm:$0xff]  }
 0xe0d   : > { %v1945_v37 = vmul.f32 1.442695, %v1944_v36 }
 0xe0f   : > { %3206 = vpow2.f32 %v1945_v37  ;;  %v2748_v37 = vld [vmem:[#allocation25] ss:$0 sm:$0xff] }
 0xe19   : > { %v3207_v41 = vpop.eup %3206 }
 0xe1a   : > { %v1947_v42 = vsel %vm870_vm2, %v3207_v41, 0.0  ;;  %v1950_v43 = vpack.c.bf16 %v3207_v41, %v3207_v41 }
 0xe1b   : > { %1948 = vadd.xlane.f32.xlu1 %v1947_v42 }
 0xe1c   : > { %2947 = vmatmul.mubr.msk.bf16.vlgmr.msra.gmra.mrb[36].mxu0 %vm870_vm2, %v1950_v43 }
 0xe1d   : > { %2957 = vmatpush3.bf16.msra.mxu0 %v2054_v44  ;;  %2958 = vmatprep.mubr.msk.bf16.mxu0 %vm3778_vm0, %v3777_v0 }
 0xe1e   : > { %2968 = vmatprep.subr.bf16.mxu0 %v3777_v0 }
 0xe24   : > { %2959 = vmatmul.mubr.msk.bf16.vlgmr.msra.gmra.mrb[40].mxu0 %vm870_vm2, %v2049_v45 }
 0xe25   : > { %2969 = vmatpush3.bf16.msra.mxu0 %v4553_v50  ;;  %2970 = vmatprep.mubr.msk.bf16.mxu0 %vm3778_vm0, %v3777_v0 }
 0xe26   : > { %2982 = vmatprep.subr.bf16.mxu0 %v3777_v0 }
 0xea8   : > { %v1949_v46 = vpop.xlane.xlu1 %1948 }
 0xea9   : > { %3208 = vrcp.f32 %v1949_v46 }
 0xeb3   : > { %v3209_v47 = vpop.eup %3208 }
 0xeef   : > { %v1993_v48 = vpop.f32.mrb[36].mxu0 }
 0xef0   : > { %v2000_v8 = vmul.f32 %v3209_v47, %v1993_v48  ;;  %v2948_v49 = vpop.f32.mrb[37].mxu0 }
 0xef1   : > { %v1996_v51 = vpop.f32.mrb[38].mxu0 }
 0xef2   : > { %v2001_v52 = vpack.c.bf16 %v2000_v8, %v2000_v8  ;;  %v2949_v53 = vpop.f32.mrb[39].mxu0 }
 0xef4   : > { %2953 = vmatmul.mubr.msk.bf16.vlgmr.msra.gmra.mrb[44].mxu1 %vm870_vm2, %v2001_v52 }
 0xef5   : > { %2964 = vmatprep.mubr.msk.bf16.mxu1 %vm3778_vm0, %v3777_v0  ;;  %2963 = vmatpush3.bf16.msra.mxu1 %v2112_v60 }
 0xef6   : > { %2974 = vmatprep.subr.bf16.mxu1 %v3777_v0 }
 0xef7   : > { %v2090_v50 = vpop.f32.mrb[40].mxu0 }
 0xef8   : > { %v2091_v54 = vadd.f32 %v2090_v50, %v4589_v31  ;;  %v2960_v55 = vpop.f32.mrb[41].mxu0 }
 0xef9   : > { %v2093_v56 = vpop.f32.mrb[42].mxu0 }
 0xefa   : > { %v2961_v57 = vpop.f32.mrb[43].mxu0  ;;  %v2096_v58 = vsel %vm870_vm2, %v2091_v54, -inf }
 0xefb   : > { %2097 = vmax.xlane.f32.xlu1 %v2096_v58 }
 0xf88   : > { %v2098_v61 = vpop.xlane.xlu1 %2097 }
 0xf89   : > { %v2099_v62 = vsub.f32 %v2091_v54, %v2098_v61 }
 0xf8b   : > { %v2100_v63 = vmul.f32 1.442695, %v2099_v62 }
 0xf8d   : > { %3210 = vpow2.f32 %v2100_v63 }
 0xf97   : > { %v3211_v1 = vpop.eup %3210 }
 0xf98   : > { %v2102_v2 = vsel %vm870_vm2, %v3211_v1, 0.0  ;;  %v2105_v31 = vpack.c.bf16 %v3211_v1, %v3211_v1 }
 0xf99   : > { %2103 = vadd.xlane.f32.xlu1 %v2102_v2 }
 0xf9a   : > { %2965 = vmatmul.mubr.msk.bf16.vlgmr.msra.gmra.mrb[48].mxu1 %vm870_vm2, %v2105_v31 }
 0xf9b   : > { %2978 = vmatprep.mubr.msk.bf16.mxu1 %vm3778_vm0, %v3777_v0  ;;  %2975 = vmatpush3.bf16.msra.mxu1 %v3176_v9 }
 0xf9c   : > { %2976 = vmatprep.subr.bf16.mxu1 %v3777_v0 }
 0xf9f   : > { %2977 = vmatpush3.bf16.msra.mxu1 %v3177_v18 }
 0xfc7   : > { %v2039_v3 = vpop.f32.mrb[44].mxu1 }
 0xfc8   : > { %v2045_v5 = vadd.f32 %v2039_v3, %v4627_v23  ;;  %v2954_v6 = vpop.f32.mrb[45].mxu1 }
 0xfc9   : > { %v2042_v38 = vpop.f32.mrb[46].mxu1 }
 0xfca   : > { %v2955_v7 = vpop.f32.mrb[47].mxu1 }
0x1026   : > { %v2104_v10 = vpop.xlane.xlu1 %2103 }
0x1027   : > { %3212 = vrcp.f32 %v2104_v10 }
0x1031   : > { %v3213_v11 = vpop.eup %3212 }
0x106d   : > { %v2148_v12 = vpop.f32.mrb[48].mxu1 }
0x106e   : > { %v2155_v13 = vmul.f32 %v3213_v11, %v2148_v12  ;;  %v2966_v14 = vpop.f32.mrb[49].mxu1 }
0x106f   : > { %v2151_v15 = vpop.f32.mrb[50].mxu1 }
0x1070   : > { %v2156_v16 = vpack.c.bf16 %v2155_v13, %v2155_v13  ;;  %v2967_v17 = vpop.f32.mrb[51].mxu1 }
0x1072   : > { %2971 = vmatmul.mubr.msk.bf16.vlgmr.msra.gmra.mrb[44].mxu0 %vm870_vm2, %v2156_v16 }
0x1073   : > { %2990 = vmatprep.mubr.msk.bf16.mxu0 %vm3778_vm0, %v3777_v0  ;;  %2983 = vmatpush3.bf16.msra.mxu0 %v3178_v19 }
0x1074   : > { %2984 = vmatprep.subr.bf16.mxu0 %v3777_v0 }
0x1077   : > { %2985 = vmatpush3.bf16.msra.mxu0 %v3179_v20 }
0x1078   : > { %2986 = vmatprep.subr.bf16.mxu0 %v3777_v0 }
0x107b   : > { %2987 = vmatpush3.bf16.msra.mxu0 %v3180_v25 }
0x107c   : > { %2988 = vmatprep.subr.bf16.mxu0 %v3777_v0 }
0x107f   : > { %2989 = vmatpush3.bf16.msra.mxu0 %v3181_v29 }
0x1145   : > { %v2194_v21 = vpop.f32.mrb[44].mxu0 }
0x1146   : > { %v2200_v22 = vadd.f32 %v2194_v21, %v2045_v5  ;;  %v2972_v23 = vpop.f32.mrb[45].mxu0 }
0x1147   : > { %v2197_v24 = vpop.f32.mrb[46].mxu0 }
0x1148   : > { %v2201_v26 = vadd.f32 %v4563_v4, %v2200_v22  ;;  %v2973_v27 = vpop.f32.mrb[47].mxu0 }
0x114a   : > { %v2202_v28 = vpack.c.bf16 %v2201_v26, %v2201_v26 }
0x114c   : > { %2979 = vmatmul.mubr.msk.bf16.vlgmr.msra.gmra.mrb[52].mxu1 %vm1536_vm3, %v2202_v28 }
0x121f   : > { %v2263_v32 = vpop.f32.mrb[52].mxu1 }
0x1220   : > { %v2264_v33 = vadd.f32 %v2744_v30, %v2263_v32  ;;  %v2980_v34 = vpop.f32.mrb[53].mxu1 }
0x1221   : > { %v2266_v35 = vpop.f32.mrb[54].mxu1 }
0x1222   : > { %v2269_v40 = vmax.f32 %v2264_v33, 0.0  ;;  %v2981_v36 = vpop.f32.mrb[55].mxu1 }
0x1224   : > { %v2270_v4 = vpack.c.bf16 %v2269_v40, %v2269_v40 }
0x1226   : > { %2991 = vmatmul.mubr.msk.bf16.vlgmr.msra.gmra.mrb[48].mxu0 %vm2310_vm4, %v2270_v4 }
0x12f9   : > { %v2348_v0 = vpop.f32.mrb[48].mxu0 }
0x12fa   : > { %v2349_v39 = vadd.f32 %v2748_v37, %v2348_v0  ;;  %v2992_v41 = vpop.f32.mrb[49].mxu0 }
0x12fb   : > { %v2351_v42 = vpop.f32.mrb[50].mxu0 }
0x12fc   : > { %v2993_v43 = vpop.f32.mrb[51].mxu0  ;;  %2354 = vst.msk [vmem:[%s862_s20] sm:$0xff] %vm1536_vm3, %v2349_v39 }
0x12fd   : > { %3661 = shalt.err (!%p3658_p6)
}
0x12fe   : > { %s3662_s13 = scalar_lea.hbm %s4673_s14, 128  ;;  %s3666_s29 = scalar_lea.hbm %s4843_s4, 256 }
0x12ff   : > { %p3663_p9 = scmp.ne.s32.totalorder %s4673_s14, %s3662_s13  ;;  %p3667_p7 = scmp.lt.u32.totalorder %s4673_s14, %s4843_s4 }
0x1300   : > { %p3668_p1 = scmp.lt.u32.totalorder %s3666_s29, %s3662_s13  ;;  %p3670_p0 = scmp.lt.u32.totalorder %s3662_s13, %s4673_s14 }
0x1301   : > { %p3664_p10 = pnand %p3663_p9, %p4844_p5 }
0x1302   : > { %p3669_p13 = por %p3668_p1, %p3667_p7 }
0x1303   : > { %p3665_p8 = pneg %p3664_p10 }
0x1304   : > { %p3671_p3 = por %p3670_p0, %p3669_p13 }
0x1306   : > { %p3672_p12 = pnand %p3671_p3, %p3665_p8 }
0x1308   : > { %3675 = shalt.err (!%p3672_p12)
}
0x1309   : > { %3040 = dma.vmem_to_hbm [thread:$0]  (%p4844_p5), %s4675_s11, 128, %s4673_s14, %s2356_s9  }
0x130a PF: > { %s4845_s8 = sld [smem:[#allocation42_spill]]  ;;  %s4846_s0 = sld [smem:[#allocation38_spill]] }
0x130b   : > { %s2382_s20 = sand.u32 1, %s3738_s18  }
0x130c   : > { %s2383_s12 = scalar_lea.sflag [#allocation4], %s2382_s20 }
0x1310   : > { %p4847_p4 = scmp.ne.s32.totalorder %s4845_s8, 0  ;;  %p4848_p2 = scmp.ge.s32.totalorder %s4846_s0, 2 }
0x1312   : > { %p3090_p11 = pnand %p4848_p2, %p4847_p4 }
0x1314   : > { %3733 = dma.done.wait (!%p3090_p11), %s2383_s12, 128  }
0x1315   : > { %3735 = vsyncadd (!%p3090_p11), %s2383_s12, 4294967168  ;;  %s44_s23 = sadd.s32 1, %s4846_s0   ;;  %s4849_s2 = sld [smem:[#allocation36_spill]] }
0x1316   : > { %p41_p6 = scmp.ge.s32.totalorder %s44_s23, 4   ;;  %s4850_s20 = sld [smem:[#allocation41_spill]] }
0x1317   : > { %s4851_s16 = sld [smem:[#allocation40_spill]]  ;;  %s4852_s18 = smov %s3742_s19 }
0x1318   : > { %s4854_s21 = smov %s3754_s22  ;;  %43 = sbr.rel (!%p41_p6) target bundleno = 32 (0x20), region = 247 }
0x131b   : > { %s4853_s19 = smov %s4849_s2 }
0x131d   : > { %s4855_s22 = smov %s4851_s16 }
0x131f   :  { %2388 = vsyncpa [#allocation3], 1 }
0x1320   :  { %2390 = vsyncpa [#allocation3 + $0x1], 1 }
0x1321   :  { %2391 = vsyncpa [#allocation6], 1 }
0x1322   :  { %2393 = vsyncpa [#allocation6 + $0x1], 1 }
0x1323   :  { %2394 = vsyncpa [#allocation9], 1 }
0x1324   :  { %2396 = vsyncpa [#allocation9 + $0x1], 1 }
0x1325   :  { %2397 = vsyncpa [#allocation12], 1 }
0x1326   :  { %2399 = vsyncpa [#allocation12 + $0x1], 1 }
0x1327   :  { %2400 = vsyncpa [#allocation15], 1 }
0x1328   :  { %2401 = vsyncpa [#allocation18], 1 }
0x1329   :  { %2402 = vsyncpa [#allocation21], 1 }
0x132a   :  { %2403 = vsyncpa [#allocation24], 1 }
0x132b   :  { %2404 = vsyncpa [#allocation4], 1 }
0x132c   :  { %2406 = vsyncpa [#allocation4 + $0x1], 1 }

</bundles_post_ra>
